<compile_context>
chip_gen: v7x
topology: tpu7x:2x2x1
jax: 0.10.0
libtpu: 0.0.40
codegen_flags: <defaults>
</compile_context>

<pallas_src>
import jax
import jax.numpy as jnp
from jax import lax
from jax.experimental import pallas as pl
from jax.experimental.pallas import tpu as pltpu

D_MODEL = 512
NUM_HEADS = 8
LN_EPS = 1e-5
VMEM_LIMIT_BYTES = 32 * 1024 * 1024   # >= default scoped limit on v5e/v6e/v7x


def _pick_tile(n, candidates=(1024, 512, 256, 128, 64, 32, 16, 8)):
    """Largest candidate tile that divides n (falls back to full extent)."""
    for t in candidates:
        if n % t == 0:
            return t
    return n


def _cparams(n_axes):
    return pltpu.CompilerParams(
        dimension_semantics=("parallel",) * n_axes,
        vmem_limit_bytes=VMEM_LIMIT_BYTES)


# ------------------ Q/K/V projections (single launch) ------------------------

def _qkv_proj_kernel(qx_ref, kx_ref, vx_ref, wq_ref, wk_ref, wv_ref,
                     bq_ref, bk_ref, bv_ref, qo_ref, ko_ref, vo_ref):
    def proj(x_ref, w_ref, b_ref, o_ref):
        y = jnp.dot(x_ref[...], w_ref[...], preferred_element_type=jnp.float32)
        o_ref[...] = (y + b_ref[...]).astype(o_ref.dtype)

    proj(qx_ref, wq_ref, bq_ref, qo_ref)
    proj(kx_ref, wk_ref, bk_ref, ko_ref)
    proj(vx_ref, wv_ref, bv_ref, vo_ref)


def qkv_projection(q_bf, k_bf, v_bf, wq, wk, wv, bq, bk, bv):
    """General (cross-attention) path: three bf16 inputs, three D x D matmuls."""
    M, D = q_bf.shape
    tm = _pick_tile(M)
    x_spec = pl.BlockSpec((tm, D), lambda i: (i, 0))
    w_spec = pl.BlockSpec((D, D), lambda i: (0, 0))     # weights stay VMEM-resident
    b_spec = pl.BlockSpec((1, D), lambda i: (0, 0))
    o_spec = pl.BlockSpec((tm, D), lambda i: (i, 0))
    out_sds = jax.ShapeDtypeStruct((M, D), jnp.bfloat16)
    return pl.pallas_call(
        _qkv_proj_kernel,
        out_shape=(out_sds, out_sds, out_sds),
        grid=(M // tm,),
        in_specs=[x_spec] * 3 + [w_spec] * 3 + [b_spec] * 3,
        out_specs=(o_spec, o_spec, o_spec),
        compiler_params=_cparams(1),
    )(q_bf, k_bf, v_bf, wq, wk, wv, bq, bk, bv)


def _qkv_proj_fused_kernel(x_ref, w_ref, b_ref, qo_ref, ko_ref, vo_ref):
    y = jnp.dot(x_ref[...], w_ref[...], preferred_element_type=jnp.float32)
    y = y + b_ref[...]
    d = qo_ref.shape[-1]
    qo_ref[...] = y[:, :d].astype(qo_ref.dtype)
    ko_ref[...] = y[:, d:2 * d].astype(ko_ref.dtype)
    vo_ref[...] = y[:, 2 * d:].astype(vo_ref.dtype)


def qkv_projection_fused(x_bf, w_cat, b_cat):
    """Self-attention fast path: one (tm,D)x(D,3D) matmul per row tile."""
    M, D = x_bf.shape
    tm = _pick_tile(M)
    o_spec = pl.BlockSpec((tm, D), lambda i: (i, 0))
    out_sds = jax.ShapeDtypeStruct((M, D), jnp.bfloat16)
    return pl.pallas_call(
        _qkv_proj_fused_kernel,
        out_shape=(out_sds, out_sds, out_sds),
        grid=(M // tm,),
        in_specs=[pl.BlockSpec((tm, D), lambda i: (i, 0)),
                  pl.BlockSpec((D, 3 * D), lambda i: (0, 0)),
                  pl.BlockSpec((1, 3 * D), lambda i: (0, 0))],
        out_specs=(o_spec, o_spec, o_spec),
        compiler_params=_cparams(1),
    )(x_bf, w_cat, b_cat)


# --------------------- attention: (batch, head, q-tile) grid -----------------

def _attention_kernel(q_ref, k_ref, v_ref, ctx_ref, attn_ref):
    # q_ref: (tq, dph) bf16 (scale already folded into the q projection)
    # k_ref, v_ref: (S, dph) bf16 — full keys/values for this (batch, head)
    q = q_ref[...]
    k = k_ref[...]
    v = v_ref[...]
    # q @ k^T without materializing a transpose.
    s = lax.dot_general(q, k, (((1,), (1,)), ((), ())),
                        preferred_element_type=jnp.float32)       # (tq, S) f32
    m = jnp.max(s, axis=-1, keepdims=True)
    e = jnp.exp(s - m)
    denom = jnp.sum(e, axis=-1, keepdims=True)
    p = e * pl.reciprocal(denom, approx=True)      # EUP slot, ~free
    p_bf = p.astype(jnp.bfloat16)
    attn_ref[...] = p_bf                           # bf16 probs: halves dominant HBM write
    # TODO(synk): dph=64 makes this ctx store a half-lane masked vst; packing to a
    # (tq//2, 128) tile requires a sublane->lane reshape Mosaic may reject, and the
    # attn-prob store above (lane-dense, S/64x larger) dominates writeback anyway.
    ctx_ref[...] = jnp.dot(p_bf, v,
                           preferred_element_type=jnp.float32).astype(ctx_ref.dtype)


def scaled_dot_product_attention(q4, k4, v4):
    B, H, S, dph = q4.shape
    tq = _pick_tile(S, (256, 128, 64, 32, 16, 8))   # >=256 for large S (MXU fill)
    nq = S // tq
    q_spec = pl.BlockSpec((None, None, tq, dph), lambda b, h, qi: (b, h, qi, 0))
    kv_spec = pl.BlockSpec((None, None, S, dph), lambda b, h, qi: (b, h, 0, 0))
    ctx_spec = pl.BlockSpec((None, None, tq, dph), lambda b, h, qi: (b, h, qi, 0))
    attn_spec = pl.BlockSpec((None, None, tq, S), lambda b, h, qi: (b, h, qi, 0))
    ctx, attn = pl.pallas_call(
        _attention_kernel,
        out_shape=(jax.ShapeDtypeStruct((B, H, S, dph), jnp.bfloat16),
                   jax.ShapeDtypeStruct((B, H, S, S), jnp.bfloat16)),
        grid=(B, H, nq),
        in_specs=[q_spec, kv_spec, kv_spec],
        out_specs=(ctx_spec, attn_spec),
        compiler_params=_cparams(3),
    )(q4, k4, v4)
    return ctx, attn


# ------------- fused output projection + residual + LayerNorm ----------------

def _out_proj_ln_kernel(ctx_ref, res_ref, wf_ref, bf_ref, g_ref, b_ref, o_ref):
    y = jnp.dot(ctx_ref[...], wf_ref[...], preferred_element_type=jnp.float32)
    x = y + bf_ref[...] + res_ref[...].astype(jnp.float32)   # residual bf16 -> f32
    mean = jnp.mean(x, axis=-1, keepdims=True)
    var = jnp.mean(jnp.square(x - mean), axis=-1, keepdims=True)
    xn = (x - mean) * lax.rsqrt(var + LN_EPS)
    o_ref[...] = (xn * g_ref[...] + b_ref[...]).astype(o_ref.dtype)


def out_proj_layer_norm(ctx2d, res2d_bf, wf, bf, gamma, beta):
    M, D = ctx2d.shape
    tm = _pick_tile(M)
    row_spec = pl.BlockSpec((tm, D), lambda i: (i, 0))
    vec_spec = pl.BlockSpec((1, D), lambda i: (0, 0))
    return pl.pallas_call(
        _out_proj_ln_kernel,
        out_shape=jax.ShapeDtypeStruct((M, D), jnp.float32),
        grid=(M // tm,),
        in_specs=[row_spec, row_spec,
                  pl.BlockSpec((D, D), lambda i: (0, 0)),
                  vec_spec, vec_spec, vec_spec],
        out_specs=row_spec,
        compiler_params=_cparams(1),
    )(ctx2d, res2d_bf, wf, bf, gamma, beta)


# ------------------------------ module forward -------------------------------

def multi_head_attention(params, key_in, value_in, query_in):
    """Mirrors MultiHeadAttention.forward (dropout=0, attn_mask=None)."""
    # TODO(synk): attn_mask is not implemented (module default is None).
    B, S, D = query_in.shape
    H = NUM_HEADS
    dph = D // H
    M = B * S
    scale = dph ** (-0.5)                 # 0.125 — exact power of two

    q_bf = query_in.reshape(M, D).astype(jnp.bfloat16)   # reused as LN residual

    # Fold the attention scale into the q projection (weights + bias).
    wq = (params["wq"] * scale).astype(jnp.bfloat16)
    wk = params["wk"].astype(jnp.bfloat16)
    wv = params["wv"].astype(jnp.bfloat16)
    bq = (params["bq"] * scale).reshape(1, D)
    bk = params["bk"].reshape(1, D)
    bv = params["bv"].reshape(1, D)

    if key_in is query_in and value_in is query_in:
        # Self-attention fast path: single fused [wq|wk|wv] projection.
        w_cat = jnp.concatenate([wq, wk, wv], axis=1)
        b_cat = jnp.concatenate([bq, bk, bv], axis=1)
        q2d, k2d, v2d = qkv_projection_fused(q_bf, w_cat, b_cat)
    else:
        k_bf = key_in.reshape(M, D).astype(jnp.bfloat16)
        v_bf = value_in.reshape(M, D).astype(jnp.bfloat16)
        q2d, k2d, v2d = qkv_projection(q_bf, k_bf, v_bf,
                                       wq, wk, wv, bq, bk, bv)

    # torch: key.view(batch*heads, -1, dim_per_head) on contiguous (B, S, D).
    # Row-major reshape reproduces that exact mapping; the extra split to
    # (B, H, S, dph) is also row-major so flat memory order is unchanged.
    q4 = q2d.reshape(B, H, S, dph)
    k4 = k2d.reshape(B, H, S, dph)
    v4 = v2d.reshape(B, H, S, dph)

    ctx4, attn4 = scaled_dot_product_attention(q4, k4, v4)

    # torch: context.view(batch, -1, dim_per_head*heads) — row-major again.
    ctx2d = ctx4.reshape(M, D)
    out2d = out_proj_layer_norm(
        ctx2d, q_bf,
        params["wf"].astype(jnp.bfloat16),
        params["bf"].reshape(1, D),
        params["ln_g"].reshape(1, D),
        params["ln_b"].reshape(1, D))
    attention = attn4.reshape(B * H, S, S)
    return out2d.reshape(B, S, D), attention


# ------------------------- reference (pure jnp, f32) -------------------------

def reference(params, key_in, value_in, query_in):
    B, S, D = query_in.shape
    H, dph = NUM_HEADS, D // NUM_HEADS
    residual = query_in.reshape(B * S, D)
    k = key_in.reshape(B * S, D) @ params["wk"] + params["bk"]
    v = value_in.reshape(B * S, D) @ params["wv"] + params["bv"]
    q = query_in.reshape(B * S, D) @ params["wq"] + params["bq"]
    k = k.reshape(B * H, S, dph)
    v = v.reshape(B * H, S, dph)
    q = q.reshape(B * H, S, dph)
    s = jnp.einsum("bij,bkj->bik", q, k) * dph ** (-0.5)
    p = jax.nn.softmax(s, axis=-1)
    ctx = jnp.einsum("bik,bkd->bid", p, v)
    out = ctx.reshape(B * S, D) @ params["wf"] + params["bf"]
    x = out + residual
    mean = x.mean(-1, keepdims=True)
    var = jnp.square(x - mean).mean(-1, keepdims=True)
    y = (x - mean) / jnp.sqrt(var + LN_EPS) * params["ln_g"] + params["ln_b"]
    return y.reshape(B, S, D), p


# --------------------------------- params -------------------------------------

def init_params(rng, d_model):
    ks = jax.random.split(rng, 8)
    bound = 1.0 / jnp.sqrt(d_model)

    def u(k, shape):
        return jax.random.uniform(k, shape, jnp.float32, -bound, bound)

    return {
        "wk": u(ks[0], (d_model, d_model)), "bk": u(ks[1], (d_model,)),
        "wv": u(ks[2], (d_model, d_model)), "bv": u(ks[3], (d_model,)),
        "wq": u(ks[4], (d_model, d_model)), "bq": u(ks[5], (d_model,)),
        "wf": u(ks[6], (d_model, d_model)), "bf": u(ks[7], (d_model,)),
        "ln_g": jnp.ones((d_model,), jnp.float32),
        "ln_b": jnp.zeros((d_model,), jnp.float32),
    }


if __name__ == "__main__":
    B, S = 2, 8
    rng = jax.random.PRNGKey(0)
    k1, k2, k3, kp = jax.random.split(rng, 4)
    key_in = jax.random.normal(k1, (B, S, D_MODEL), jnp.float32)
    value_in = jax.random.normal(k2, (B, S, D_MODEL), jnp.float32)
    query_in = jax.random.normal(k3, (B, S, D_MODEL), jnp.float32)
    params = init_params(kp, D_MODEL)

    # General (cross-attention) path.
    mha = jax.jit(multi_head_attention)
    out, attn = mha(params, key_in, value_in, query_in)
    jax.block_until_ready((out, attn))
    assert out.shape == (B, S, D_MODEL)
    assert attn.shape == (B * NUM_HEADS, S, S)

    ref_out, ref_attn = reference(params, key_in, value_in, query_in)
    err_o = float(jnp.max(jnp.abs(out - ref_out)))
    err_a = float(jnp.max(jnp.abs(attn.astype(jnp.float32) - ref_attn)))
    if err_o > 5e-2 or err_a > 5e-2:
        raise SystemExit(f"cross-attn mismatch: out_err={err_o} attn_err={err_a}")

    # Self-attention fast path (fused [wq|wk|wv] projection).
    mha_self = jax.jit(lambda p, x: multi_head_attention(p, x, x, x))
    out_s, attn_s = mha_self(params, query_in)
    jax.block_until_ready((out_s, attn_s))
    ref_out_s, ref_attn_s = reference(params, query_in, query_in, query_in)
    err_o = float(jnp.max(jnp.abs(out_s - ref_out_s)))
    err_a = float(jnp.max(jnp.abs(attn_s.astype(jnp.float32) - ref_attn_s)))
    if err_o > 5e-2 or err_a > 5e-2:
        raise SystemExit(f"self-attn mismatch: out_err={err_o} attn_err={err_a}")

    print("KERNEL_OK")
</pallas_src>

<mosaic_0001>
module attributes {stable_mosaic.version = 11 : i64} {
  func.func @_qkv_proj_kernel(%arg0: i32, %arg1: memref<16x512xbf16, #tpu.memory_space<vmem>>, %arg2: memref<16x512xbf16, #tpu.memory_space<vmem>>, %arg3: memref<16x512xbf16, #tpu.memory_space<vmem>>, %arg4: memref<512x512xbf16, #tpu.memory_space<vmem>>, %arg5: memref<512x512xbf16, #tpu.memory_space<vmem>>, %arg6: memref<512x512xbf16, #tpu.memory_space<vmem>>, %arg7: memref<1x512xf32, #tpu.memory_space<vmem>>, %arg8: memref<1x512xf32, #tpu.memory_space<vmem>>, %arg9: memref<1x512xf32, #tpu.memory_space<vmem>>, %arg10: memref<16x512xbf16, #tpu.memory_space<vmem>>, %arg11: memref<16x512xbf16, #tpu.memory_space<vmem>>, %arg12: memref<16x512xbf16, #tpu.memory_space<vmem>>) attributes {dimension_semantics = [#tpu.dimension_semantics<parallel>], iteration_bounds = array<i64: 1>, scalar_prefetch = 0 : i64, scratch_operands = 0 : i64, tpu.core_type = #tpu.core_type<tc>, window_params = [{transform_indices = @transform_0, window_bounds = array<i64: 16, 512>}, {transform_indices = @transform_1, window_bounds = array<i64: 16, 512>}, {transform_indices = @transform_2, window_bounds = array<i64: 16, 512>}, {pipeline_mode = #tpu.pipeline_mode<synchronous>, transform_indices = @transform_3, window_bounds = array<i64: 512, 512>}, {pipeline_mode = #tpu.pipeline_mode<synchronous>, transform_indices = @transform_4, window_bounds = array<i64: 512, 512>}, {pipeline_mode = #tpu.pipeline_mode<synchronous>, transform_indices = @transform_5, window_bounds = array<i64: 512, 512>}, {pipeline_mode = #tpu.pipeline_mode<synchronous>, transform_indices = @transform_6, window_bounds = array<i64: 1, 512>}, {pipeline_mode = #tpu.pipeline_mode<synchronous>, transform_indices = @transform_7, window_bounds = array<i64: 1, 512>}, {pipeline_mode = #tpu.pipeline_mode<synchronous>, transform_indices = @transform_8, window_bounds = array<i64: 1, 512>}, {transform_indices = @transform_9, window_bounds = array<i64: 16, 512>}, {transform_indices = @transform_10, window_bounds = array<i64: 16, 512>}, {transform_indices = @transform_11, window_bounds = array<i64: 16, 512>}]} {
    %c0 = arith.constant 0 : index
    %c0_0 = arith.constant 0 : index
    %0 = vector.load %arg1[%c0, %c0_0] : memref<16x512xbf16, #tpu.memory_space<vmem>>, vector<16x512xbf16>
    %c0_1 = arith.constant 0 : index
    %c0_2 = arith.constant 0 : index
    %1 = vector.load %arg4[%c0_1, %c0_2] : memref<512x512xbf16, #tpu.memory_space<vmem>>, vector<512x512xbf16>
    %cst = arith.constant dense<0.000000e+00> : vector<16x512xf32>
    %2 = tpu.matmul %0, %1, %cst {dimension_numbers = #tpu.dot_dimension_numbers<[1], [0], [0], [1], [0, 0, 1, 1], [], []>} : vector<16x512xbf16>, vector<512x512xbf16>, vector<16x512xf32> -> vector<16x512xf32>
    %c0_3 = arith.constant 0 : index
    %c0_4 = arith.constant 0 : index
    %3 = vector.load %arg7[%c0_3, %c0_4] : memref<1x512xf32, #tpu.memory_space<vmem>>, vector<1x512xf32>
    %4 = vector.broadcast %3 : vector<1x512xf32> to vector<16x512xf32>
    %5 = arith.addf %2, %4 : vector<16x512xf32>
    %6 = arith.truncf %5 : vector<16x512xf32> to vector<16x512xbf16>
    %c0_5 = arith.constant 0 : index
    %c0_6 = arith.constant 0 : index
    %7 = vector.load %arg10[%c0_5, %c0_6] : memref<16x512xbf16, #tpu.memory_space<vmem>>, vector<16x512xbf16>
    tpu.vector_store %arg10[%c0_5, %c0_6], %6 {strides = array<i32>} : memref<16x512xbf16, #tpu.memory_space<vmem>>, vector<16x512xbf16>,
    %c0_7 = arith.constant 0 : index
    %c0_8 = arith.constant 0 : index
    %8 = vector.load %arg2[%c0_7, %c0_8] : memref<16x512xbf16, #tpu.memory_space<vmem>>, vector<16x512xbf16>
    %c0_9 = arith.constant 0 : index
    %c0_10 = arith.constant 0 : index
    %9 = vector.load %arg5[%c0_9, %c0_10] : memref<512x512xbf16, #tpu.memory_space<vmem>>, vector<512x512xbf16>
    %cst_11 = arith.constant dense<0.000000e+00> : vector<16x512xf32>
    %10 = tpu.matmul %8, %9, %cst_11 {dimension_numbers = #tpu.dot_dimension_numbers<[1], [0], [0], [1], [0, 0, 1, 1], [], []>} : vector<16x512xbf16>, vector<512x512xbf16>, vector<16x512xf32> -> vector<16x512xf32>
    %c0_12 = arith.constant 0 : index
    %c0_13 = arith.constant 0 : index
    %11 = vector.load %arg8[%c0_12, %c0_13] : memref<1x512xf32, #tpu.memory_space<vmem>>, vector<1x512xf32>
    %12 = vector.broadcast %11 : vector<1x512xf32> to vector<16x512xf32>
    %13 = arith.addf %10, %12 : vector<16x512xf32>
    %14 = arith.truncf %13 : vector<16x512xf32> to vector<16x512xbf16>
    %c0_14 = arith.constant 0 : index
    %c0_15 = arith.constant 0 : index
    %15 = vector.load %arg11[%c0_14, %c0_15] : memref<16x512xbf16, #tpu.memory_space<vmem>>, vector<16x512xbf16>
    tpu.vector_store %arg11[%c0_14, %c0_15], %14 {strides = array<i32>} : memref<16x512xbf16, #tpu.memory_space<vmem>>, vector<16x512xbf16>,
    %c0_16 = arith.constant 0 : index
    %c0_17 = arith.constant 0 : index
    %16 = vector.load %arg3[%c0_16, %c0_17] : memref<16x512xbf16, #tpu.memory_space<vmem>>, vector<16x512xbf16>
    %c0_18 = arith.constant 0 : index
    %c0_19 = arith.constant 0 : index
    %17 = vector.load %arg6[%c0_18, %c0_19] : memref<512x512xbf16, #tpu.memory_space<vmem>>, vector<512x512xbf16>
    %cst_20 = arith.constant dense<0.000000e+00> : vector<16x512xf32>
    %18 = tpu.matmul %16, %17, %cst_20 {dimension_numbers = #tpu.dot_dimension_numbers<[1], [0], [0], [1], [0, 0, 1, 1], [], []>} : vector<16x512xbf16>, vector<512x512xbf16>, vector<16x512xf32> -> vector<16x512xf32>
    %c0_21 = arith.constant 0 : index
    %c0_22 = arith.constant 0 : index
    %19 = vector.load %arg9[%c0_21, %c0_22] : memref<1x512xf32, #tpu.memory_space<vmem>>, vector<1x512xf32>
    %20 = vector.broadcast %19 : vector<1x512xf32> to vector<16x512xf32>
    %21 = arith.addf %18, %20 : vector<16x512xf32>
    %22 = arith.truncf %21 : vector<16x512xf32> to vector<16x512xbf16>
    %c0_23 = arith.constant 0 : index
    %c0_24 = arith.constant 0 : index
    %23 = vector.load %arg12[%c0_23, %c0_24] : memref<16x512xbf16, #tpu.memory_space<vmem>>, vector<16x512xbf16>
    tpu.vector_store %arg12[%c0_23, %c0_24], %22 {strides = array<i32>} : memref<16x512xbf16, #tpu.memory_space<vmem>>, vector<16x512xbf16>,
    return
  }
  func.func @transform_0(%arg0: i32) -> (i32, i32) {
    %c0_i32 = arith.constant 0 : i32
    %c0_i32_0 = arith.constant 0 : i32
    return %arg0, %c0_i32 : i32, i32
  }
  func.func @transform_1(%arg0: i32) -> (i32, i32) {
    %c0_i32 = arith.constant 0 : i32
    %c0_i32_0 = arith.constant 0 : i32
    return %arg0, %c0_i32 : i32, i32
  }
  func.func @transform_2(%arg0: i32) -> (i32, i32) {
    %c0_i32 = arith.constant 0 : i32
    %c0_i32_0 = arith.constant 0 : i32
    return %arg0, %c0_i32 : i32, i32
  }
  func.func @transform_3(%arg0: i32) -> (i32, i32) {
    %c0_i32 = arith.constant 0 : i32
    %c0_i32_0 = arith.constant 0 : i32
    %c0_i32_1 = arith.constant 0 : i32
    return %c0_i32, %c0_i32_0 : i32, i32
  }
  func.func @transform_4(%arg0: i32) -> (i32, i32) {
    %c0_i32 = arith.constant 0 : i32
    %c0_i32_0 = arith.constant 0 : i32
    %c0_i32_1 = arith.constant 0 : i32
    return %c0_i32, %c0_i32_0 : i32, i32
  }
  func.func @transform_5(%arg0: i32) -> (i32, i32) {
    %c0_i32 = arith.constant 0 : i32
    %c0_i32_0 = arith.constant 0 : i32
    %c0_i32_1 = arith.constant 0 : i32
    return %c0_i32, %c0_i32_0 : i32, i32
  }
  func.func @transform_6(%arg0: i32) -> (i32, i32) {
    %c0_i32 = arith.constant 0 : i32
    %c0_i32_0 = arith.constant 0 : i32
    %c0_i32_1 = arith.constant 0 : i32
    return %c0_i32, %c0_i32_0 : i32, i32
  }
  func.func @transform_7(%arg0: i32) -> (i32, i32) {
    %c0_i32 = arith.constant 0 : i32
    %c0_i32_0 = arith.constant 0 : i32
    %c0_i32_1 = arith.constant 0 : i32
    return %c0_i32, %c0_i32_0 : i32, i32
  }
  func.func @transform_8(%arg0: i32) -> (i32, i32) {
    %c0_i32 = arith.constant 0 : i32
    %c0_i32_0 = arith.constant 0 : i32
    %c0_i32_1 = arith.constant 0 : i32
    return %c0_i32, %c0_i32_0 : i32, i32
  }
  func.func @transform_9(%arg0: i32) -> (i32, i32) {
    %c0_i32 = arith.constant 0 : i32
    %c0_i32_0 = arith.constant 0 : i32
    return %arg0, %c0_i32 : i32, i32
  }
  func.func @transform_10(%arg0: i32) -> (i32, i32) {
    %c0_i32 = arith.constant 0 : i32
    %c0_i32_0 = arith.constant 0 : i32
    return %arg0, %c0_i32 : i32, i32
  }
  func.func @transform_11(%arg0: i32) -> (i32, i32) {
    %c0_i32 = arith.constant 0 : i32
    %c0_i32_0 = arith.constant 0 : i32
    return %arg0, %c0_i32 : i32, i32
  }
}

module attributes {stable_mosaic.version = 11 : i64} {
  func.func @_attention_kernel(%arg0: i32, %arg1: i32, %arg2: i32, %arg3: memref<1x1x8x64xbf16, #tpu.memory_space<vmem>>, %arg4: memref<1x1x8x64xbf16, #tpu.memory_space<vmem>>, %arg5: memref<1x1x8x64xbf16, #tpu.memory_space<vmem>>, %arg6: memref<1x1x8x64xbf16, #tpu.memory_space<vmem>>, %arg7: memref<1x1x8x8xbf16, #tpu.memory_space<vmem>>) attributes {dimension_semantics = [#tpu.dimension_semantics<parallel>, #tpu.dimension_semantics<parallel>, #tpu.dimension_semantics<parallel>], iteration_bounds = array<i64: 2, 8, 1>, scalar_prefetch = 0 : i64, scratch_operands = 0 : i64, tpu.core_type = #tpu.core_type<tc>, window_params = [{transform_indices = @transform_0, window_bounds = array<i64: 1, 1, 8, 64>}, {transform_indices = @transform_1, window_bounds = array<i64: 1, 1, 8, 64>}, {transform_indices = @transform_2, window_bounds = array<i64: 1, 1, 8, 64>}, {transform_indices = @transform_3, window_bounds = array<i64: 1, 1, 8, 64>}, {transform_indices = @transform_4, window_bounds = array<i64: 1, 1, 8, 8>}]} {
    %c0 = arith.constant 0 : index
    %c0_0 = arith.constant 0 : index
    %c0_1 = arith.constant 0 : index
    %c0_2 = arith.constant 0 : index
    %0 = vector.load %arg3[%c0, %c0_0, %c0_1, %c0_2] : memref<1x1x8x64xbf16, #tpu.memory_space<vmem>>, vector<1x1x8x64xbf16>
    %1 = vector.shape_cast %0 : vector<1x1x8x64xbf16> to vector<8x64xbf16>
    %c0_3 = arith.constant 0 : index
    %c0_4 = arith.constant 0 : index
    %c0_5 = arith.constant 0 : index
    %c0_6 = arith.constant 0 : index
    %2 = vector.load %arg4[%c0_3, %c0_4, %c0_5, %c0_6] : memref<1x1x8x64xbf16, #tpu.memory_space<vmem>>, vector<1x1x8x64xbf16>
    %3 = vector.shape_cast %2 : vector<1x1x8x64xbf16> to vector<8x64xbf16>
    %c0_7 = arith.constant 0 : index
    %c0_8 = arith.constant 0 : index
    %c0_9 = arith.constant 0 : index
    %c0_10 = arith.constant 0 : index
    %4 = vector.load %arg5[%c0_7, %c0_8, %c0_9, %c0_10] : memref<1x1x8x64xbf16, #tpu.memory_space<vmem>>, vector<1x1x8x64xbf16>
    %5 = vector.shape_cast %4 : vector<1x1x8x64xbf16> to vector<8x64xbf16>
    %cst = arith.constant dense<0.000000e+00> : vector<8x8xf32>
    %6 = tpu.matmul %1, %3, %cst {dimension_numbers = #tpu.dot_dimension_numbers<[1], [1], [0], [0], [0, 0, 1, 0], [], []>} : vector<8x64xbf16>, vector<8x64xbf16>, vector<8x8xf32> -> vector<8x8xf32>
    %cst_11 = arith.constant dense<0xFF800000> : vector<8xf32>
    %7 = vector.multi_reduction <maximumf>, %6, %cst_11 [1] : vector<8x8xf32> to vector<8xf32>
    %8 = vector.shape_cast %7 : vector<8xf32> to vector<8x1xf32>
    %9 = vector.broadcast %8 : vector<8x1xf32> to vector<8x8xf32>
    %10 = arith.subf %6, %9 : vector<8x8xf32>
    %11 = math.exp %10 : vector<8x8xf32>
    %cst_12 = arith.constant dense<0.000000e+00> : vector<8xf32>
    %12 = vector.multi_reduction <add>, %11, %cst_12 [1] : vector<8x8xf32> to vector<8xf32>
    %13 = vector.shape_cast %12 : vector<8xf32> to vector<8x1xf32>
    %14 = tpu.reciprocal %13 {approx = true} : vector<8x1xf32> -> vector<8x1xf32>
    %15 = vector.broadcast %14 : vector<8x1xf32> to vector<8x8xf32>
    %16 = arith.mulf %11, %15 : vector<8x8xf32>
    %17 = arith.truncf %16 : vector<8x8xf32> to vector<8x8xbf16>
    %c0_13 = arith.constant 0 : index
    %c0_14 = arith.constant 0 : index
    %c0_15 = arith.constant 0 : index
    %c0_16 = arith.constant 0 : index
    %18 = vector.load %arg7[%c0_13, %c0_14, %c0_15, %c0_16] : memref<1x1x8x8xbf16, #tpu.memory_space<vmem>>, vector<1x1x8x8xbf16>
    %19 = vector.shape_cast %18 : vector<1x1x8x8xbf16> to vector<8x8xbf16>
    %20 = vector.shape_cast %17 : vector<8x8xbf16> to vector<1x1x8x8xbf16>
    tpu.vector_store %arg7[%c0_13, %c0_14, %c0_15, %c0_16], %20 {strides = array<i32>} : memref<1x1x8x8xbf16, #tpu.memory_space<vmem>>, vector<1x1x8x8xbf16>,
    %cst_17 = arith.constant dense<0.000000e+00> : vector<8x64xf32>
    %21 = tpu.matmul %17, %5, %cst_17 {dimension_numbers = #tpu.dot_dimension_numbers<[1], [0], [0], [1], [0, 0, 1, 1], [], []>} : vector<8x8xbf16>, vector<8x64xbf16>, vector<8x64xf32> -> vector<8x64xf32>
    %22 = arith.truncf %21 : vector<8x64xf32> to vector<8x64xbf16>
    %c0_18 = arith.constant 0 : index
    %c0_19 = arith.constant 0 : index
    %c0_20 = arith.constant 0 : index
    %c0_21 = arith.constant 0 : index
    %23 = vector.load %arg6[%c0_18, %c0_19, %c0_20, %c0_21] : memref<1x1x8x64xbf16, #tpu.memory_space<vmem>>, vector<1x1x8x64xbf16>
    %24 = vector.shape_cast %23 : vector<1x1x8x64xbf16> to vector<8x64xbf16>
    %25 = vector.shape_cast %22 : vector<8x64xbf16> to vector<1x1x8x64xbf16>
    tpu.vector_store %arg6[%c0_18, %c0_19, %c0_20, %c0_21], %25 {strides = array<i32>} : memref<1x1x8x64xbf16, #tpu.memory_space<vmem>>, vector<1x1x8x64xbf16>,
    return
  }
  func.func @transform_0(%arg0: i32, %arg1: i32, %arg2: i32) -> (i32, i32, i32, i32) {
    %c0_i32 = arith.constant 0 : i32
    %c0_i32_0 = arith.constant 0 : i32
    return %arg0, %arg1, %arg2, %c0_i32 : i32, i32, i32, i32
  }
  func.func @transform_1(%arg0: i32, %arg1: i32, %arg2: i32) -> (i32, i32, i32, i32) {
    %c0_i32 = arith.constant 0 : i32
    %c0_i32_0 = arith.constant 0 : i32
    %c0_i32_1 = arith.constant 0 : i32
    return %arg0, %arg1, %c0_i32, %c0_i32_0 : i32, i32, i32, i32
  }
  func.func @transform_2(%arg0: i32, %arg1: i32, %arg2: i32) -> (i32, i32, i32, i32) {
    %c0_i32 = arith.constant 0 : i32
    %c0_i32_0 = arith.constant 0 : i32
    %c0_i32_1 = arith.constant 0 : i32
    return %arg0, %arg1, %c0_i32, %c0_i32_0 : i32, i32, i32, i32
  }
  func.func @transform_3(%arg0: i32, %arg1: i32, %arg2: i32) -> (i32, i32, i32, i32) {
    %c0_i32 = arith.constant 0 : i32
    %c0_i32_0 = arith.constant 0 : i32
    return %arg0, %arg1, %arg2, %c0_i32 : i32, i32, i32, i32
  }
  func.func @transform_4(%arg0: i32, %arg1: i32, %arg2: i32) -> (i32, i32, i32, i32) {
    %c0_i32 = arith.constant 0 : i32
    %c0_i32_0 = arith.constant 0 : i32
    return %arg0, %arg1, %arg2, %c0_i32 : i32, i32, i32, i32
  }
}

module attributes {stable_mosaic.version = 11 : i64} {
  func.func @_out_proj_ln_kernel(%arg0: i32, %arg1: memref<16x512xbf16, #tpu.memory_space<vmem>>, %arg2: memref<16x512xbf16, #tpu.memory_space<vmem>>, %arg3: memref<512x512xbf16, #tpu.memory_space<vmem>>, %arg4: memref<1x512xf32, #tpu.memory_space<vmem>>, %arg5: memref<1x512xf32, #tpu.memory_space<vmem>>, %arg6: memref<1x512xf32, #tpu.memory_space<vmem>>, %arg7: memref<16x512xf32, #tpu.memory_space<vmem>>) attributes {dimension_semantics = [#tpu.dimension_semantics<parallel>], iteration_bounds = array<i64: 1>, scalar_prefetch = 0 : i64, scratch_operands = 0 : i64, tpu.core_type = #tpu.core_type<tc>, window_params = [{transform_indices = @transform_0, window_bounds = array<i64: 16, 512>}, {transform_indices = @transform_1, window_bounds = array<i64: 16, 512>}, {pipeline_mode = #tpu.pipeline_mode<synchronous>, transform_indices = @transform_2, window_bounds = array<i64: 512, 512>}, {pipeline_mode = #tpu.pipeline_mode<synchronous>, transform_indices = @transform_3, window_bounds = array<i64: 1, 512>}, {pipeline_mode = #tpu.pipeline_mode<synchronous>, transform_indices = @transform_4, window_bounds = array<i64: 1, 512>}, {pipeline_mode = #tpu.pipeline_mode<synchronous>, transform_indices = @transform_5, window_bounds = array<i64: 1, 512>}, {transform_indices = @transform_6, window_bounds = array<i64: 16, 512>}]} {
    %c0 = arith.constant 0 : index
    %c0_0 = arith.constant 0 : index
    %0 = vector.load %arg1[%c0, %c0_0] : memref<16x512xbf16, #tpu.memory_space<vmem>>, vector<16x512xbf16>
    %c0_1 = arith.constant 0 : index
    %c0_2 = arith.constant 0 : index
    %1 = vector.load %arg3[%c0_1, %c0_2] : memref<512x512xbf16, #tpu.memory_space<vmem>>, vector<512x512xbf16>
    %cst = arith.constant dense<0.000000e+00> : vector<16x512xf32>
    %2 = tpu.matmul %0, %1, %cst {dimension_numbers = #tpu.dot_dimension_numbers<[1], [0], [0], [1], [0, 0, 1, 1], [], []>} : vector<16x512xbf16>, vector<512x512xbf16>, vector<16x512xf32> -> vector<16x512xf32>
    %c0_3 = arith.constant 0 : index
    %c0_4 = arith.constant 0 : index
    %3 = vector.load %arg4[%c0_3, %c0_4] : memref<1x512xf32, #tpu.memory_space<vmem>>, vector<1x512xf32>
    %4 = vector.broadcast %3 : vector<1x512xf32> to vector<16x512xf32>
    %5 = arith.addf %2, %4 : vector<16x512xf32>
    %c0_5 = arith.constant 0 : index
    %c0_6 = arith.constant 0 : index
    %6 = vector.load %arg2[%c0_5, %c0_6] : memref<16x512xbf16, #tpu.memory_space<vmem>>, vector<16x512xbf16>
    %7 = arith.extf %6 : vector<16x512xbf16> to vector<16x512xf32>
    %8 = arith.addf %5, %7 : vector<16x512xf32>
    %cst_7 = arith.constant dense<0.000000e+00> : vector<16xf32>
    %9 = vector.multi_reduction <add>, %8, %cst_7 [1] : vector<16x512xf32> to vector<16xf32>
    %10 = vector.shape_cast %9 : vector<16xf32> to vector<16x1xf32>
    %cst_8 = arith.constant 5.120000e+02 : f32
    %11 = vector.broadcast %cst_8 : f32 to vector<16x1xf32>
    %12 = arith.divf %10, %11 : vector<16x1xf32>
    %13 = vector.broadcast %12 : vector<16x1xf32> to vector<16x512xf32>
    %14 = arith.subf %8, %13 : vector<16x512xf32>
    %15 = arith.mulf %14, %14 : vector<16x512xf32>
    %cst_9 = arith.constant dense<0.000000e+00> : vector<16xf32>
    %16 = vector.multi_reduction <add>, %15, %cst_9 [1] : vector<16x512xf32> to vector<16xf32>
    %17 = vector.shape_cast %16 : vector<16xf32> to vector<16x1xf32>
    %cst_10 = arith.constant 5.120000e+02 : f32
    %18 = vector.broadcast %cst_10 : f32 to vector<16x1xf32>
    %19 = arith.divf %17, %18 : vector<16x1xf32>
    %20 = vector.broadcast %12 : vector<16x1xf32> to vector<16x512xf32>
    %21 = arith.subf %8, %20 : vector<16x512xf32>
    %cst_11 = arith.constant 9.99999974E-6 : f32
    %22 = vector.broadcast %cst_11 : f32 to vector<16x1xf32>
    %23 = arith.addf %19, %22 : vector<16x1xf32>
    %24 = math.rsqrt %23 : vector<16x1xf32>
    %25 = vector.broadcast %24 : vector<16x1xf32> to vector<16x512xf32>
    %26 = arith.mulf %21, %25 : vector<16x512xf32>
    %c0_12 = arith.constant 0 : index
    %c0_13 = arith.constant 0 : index
    %27 = vector.load %arg5[%c0_12, %c0_13] : memref<1x512xf32, #tpu.memory_space<vmem>>, vector<1x512xf32>
    %28 = vector.broadcast %27 : vector<1x512xf32> to vector<16x512xf32>
    %29 = arith.mulf %26, %28 : vector<16x512xf32>
    %c0_14 = arith.constant 0 : index
    %c0_15 = arith.constant 0 : index
    %30 = vector.load %arg6[%c0_14, %c0_15] : memref<1x512xf32, #tpu.memory_space<vmem>>, vector<1x512xf32>
    %31 = vector.broadcast %30 : vector<1x512xf32> to vector<16x512xf32>
    %32 = arith.addf %29, %31 : vector<16x512xf32>
    %c0_16 = arith.constant 0 : index
    %c0_17 = arith.constant 0 : index
    %33 = vector.load %arg7[%c0_16, %c0_17] : memref<16x512xf32, #tpu.memory_space<vmem>>, vector<16x512xf32>
    tpu.vector_store %arg7[%c0_16, %c0_17], %32 {strides = array<i32>} : memref<16x512xf32, #tpu.memory_space<vmem>>, vector<16x512xf32>,
    return
  }
  func.func @transform_0(%arg0: i32) -> (i32, i32) {
    %c0_i32 = arith.constant 0 : i32
    %c0_i32_0 = arith.constant 0 : i32
    return %arg0, %c0_i32 : i32, i32
  }
  func.func @transform_1(%arg0: i32) -> (i32, i32) {
    %c0_i32 = arith.constant 0 : i32
    %c0_i32_0 = arith.constant 0 : i32
    return %arg0, %c0_i32 : i32, i32
  }
  func.func @transform_2(%arg0: i32) -> (i32, i32) {
    %c0_i32 = arith.constant 0 : i32
    %c0_i32_0 = arith.constant 0 : i32
    %c0_i32_1 = arith.constant 0 : i32
    return %c0_i32, %c0_i32_0 : i32, i32
  }
  func.func @transform_3(%arg0: i32) -> (i32, i32) {
    %c0_i32 = arith.constant 0 : i32
    %c0_i32_0 = arith.constant 0 : i32
    %c0_i32_1 = arith.constant 0 : i32
    return %c0_i32, %c0_i32_0 : i32, i32
  }
  func.func @transform_4(%arg0: i32) -> (i32, i32) {
    %c0_i32 = arith.constant 0 : i32
    %c0_i32_0 = arith.constant 0 : i32
    %c0_i32_1 = arith.constant 0 : i32
    return %c0_i32, %c0_i32_0 : i32, i32
  }
  func.func @transform_5(%arg0: i32) -> (i32, i32) {
    %c0_i32 = arith.constant 0 : i32
    %c0_i32_0 = arith.constant 0 : i32
    %c0_i32_1 = arith.constant 0 : i32
    return %c0_i32, %c0_i32_0 : i32, i32
  }
  func.func @transform_6(%arg0: i32) -> (i32, i32) {
    %c0_i32 = arith.constant 0 : i32
    %c0_i32_0 = arith.constant 0 : i32
    return %arg0, %c0_i32 : i32, i32
  }
}

</mosaic_0001>

<bundles_post_ra>
// kernel: multi_head_attention.4
= control target key start
LH: loop header
LB: loop body
LE: loop exit
PB: predicated region body
PF: predicated region fallthrough
CT: control target
= control target key end

     0   :  { %s805_s15 = smov 0   ;;  %s807_s16 = smov 0   ;;  %s875_s0 = inlined_call_operand.vmem [shape: bf16[2,8,8,64], index: 0, kind: input, shape index: {}]   ;;  %s876_s1 = inlined_call_operand.vmem [shape: bf16[2,8,8,64], index: 1, kind: input, shape index: {}]   ;;  %s877_s2 = inlined_call_operand.vmem [shape: bf16[2,8,8,64], index: 2, kind: input, shape index: {}]   ;;  %s878_s3 = inlined_call_operand.vmem [shape: bf16[2,8,8,64], index: 3, kind: output, shape index: {0}]   ;;  %s879_s4 = inlined_call_operand.vmem [shape: bf16[2,8,8,8], index: 4, kind: output, shape index: {1}]  }
   0x1   :  { %s809_s17 = smov 0   ;;  %s811_s18 = smov 0  }
   0x2   :  { %s813_s19 = smov 0  }
   0x3 LB: > { %s30_s20 = sadd.s32 1, %s768_s17  ;;  %s34_s21 = sadd.s32 1, %s772_s18  ;;  %s776_s19 = sphi %s813_s19, %s15_s19   ;;  %s772_s18 = sphi %s811_s18, %s883_s18   ;;  %s768_s17 = sphi %s809_s17, %s882_s17   ;;  %s764_s16 = sphi %s807_s16, %s881_s16   ;;  %s760_s15 = sphi %s805_s15, %s880_s15  }
   0x4   : > { %p32_p0 = scmp.ge.s32.totalorder %s30_s20, 8  ;;  %p661_p1 = scmp.ge.s32.totalorder %s776_s19, 1 }
   0x5   : > { %p232_p2 = scmp.lt.s32.totalorder %s776_s19, 17 }
   0x6   : > { %s885_s20 = smov (%p32_p0, %s30_s20), 0  ;;  %s887_s21 = smov (!%p32_p0, %s34_s21), %s772_s18 }
   0x7   : > { %p233_p3 = pnand %p661_p1, %p232_p2  ;;  %p36_p4 = scmp.ge.s32.totalorder %s887_s21, 2 }
   0x8   : > { %p297_p5 = scmp.lt.s32.totalorder (!%p233_p3), %s764_s16, 1  ;;  %p299_p6 = scmp.lt.s32.totalorder (!%p233_p3), %s760_s15, 7  ;;  %v778_v0 = vmov (!%p233_p3), 0.0   ;;  %vm779_vm0 = vmmov (!%p233_p3), 0   ;;  %vm350_vm1 = vcmask (!%p233_p3), 523264   ;;  %vm397_vm2 = vcmask (!%p233_p3), 64512  }
   0x9   : > { %s889_s21 = smov (%p36_p4, %s887_s21), 0  ;;  %236 = sbr.rel (%p233_p3) target bundleno = 773 (0x305), region = 32 }
   0xa   : > { %680 = vmatprep.subr.bf16.mxu0 (!%p233_p3), %v778_v0  ;;  %682 = vmatprep.mubr.msk.bf16.mxu0 (!%p233_p3), %vm779_vm0, %v778_v0  ;;  %vm415_vm3 = vcmask (!%p233_p3), 1043456   ;;  %vm410_vm4 = vcmask (!%p233_p3), 60416   ;;  %vm460_vm5 = vcmask (!%p233_p3), 519168  }
   0xb   : > { %686 = vmatprep.subr.bf16.mxu1 (!%p233_p3), %v778_v0  ;;  %688 = vmatprep.mubr.msk.bf16.mxu1 (!%p233_p3), %vm779_vm0, %v778_v0 }
  0x10   : > { %s891_s16 = smov (!%p297_p5, %s764_s16), 1  ;;  %s893_s15 = smov (!%p299_p6, %s760_s15), 7 }
  0x11   : > { %s662_s22 = sshll.u32 %s891_s16, 3 }
  0x12   : > { %s305_s23 = sadd.s32 %s662_s22, %s893_s15 }
  0x13   : > { %s835_s24 = sshll.u32 %s305_s23, 2 }
  0x14   : > { %s315_s27 = scalar_lea.vmem %s876_s1, %s835_s24  ;;  %s307_s30 = scalar_lea.vmem %s875_s0, %s835_s24 }
  0x15   : > { %v348_v1 = vld [vmem:[%s315_s27] sm:$0xf]  ;;  %s323_s7 = scalar_lea.vmem %s877_s2, %s835_s24  ;;  %s345_s10 = scalar_lea.vmem %s879_s4, %s835_s24 }
  0x16   : > { %v355_v2 = vsel %vm350_vm1, %v348_v1, 0  ;;  %v347_v3 = vld [vmem:[%s307_s30] sm:$0xf]  ;;  %s334_s13 = scalar_lea.vmem %s878_s3, %s835_s24 }
  0x17   : > { %681 = vmatpush3.bf16.xpose.msra.mxu0 %v355_v2  ;;  %v349_v14 = vld [vmem:[%s323_s7] sm:$0xf] }
  0x18   : > { %v417_v15 = vsel %vm415_vm3, %v349_v14, 0 }
  0x19   : > { %687 = vmatpush3.bf16.msra.mxu1 %v417_v15 }
  0x1e   : > { %683 = vmatmul.mubr.msk.bf16.vlgmr.msra.gmra.mrb[0].mxu0 %vm350_vm1, %v347_v3 }
  0xf1   : > { %v391_v4 = vpop.f32.mrb[0].mxu0 }
  0xf2   : > { %v684_v5 = vpop.f32.mrb[1].mxu0  ;;  %v398_v6 = vsel %vm397_vm2, %v391_v4, -inf }
  0xf3   : > { %399 = vmax.xlane.f32.xlu0 %v398_v6  ;;  %v394_v7 = vpop.f32.mrb[2].mxu0 }
  0xf4   : > { %v685_v8 = vpop.f32.mrb[3].mxu0 }
 0x180   : > { %v400_v9 = vpop.xlane.xlu0 %399 }
 0x181   : > { %v401_v10 = vsub.f32 %v391_v4, %v400_v9 }
 0x183   : > { %v402_v11 = vmul.f32 1.442695, %v401_v10 }
 0x185   : > { %734 = vpow2.f32 %v402_v11 }
 0x18f   : > { %v735_v12 = vpop.eup %734 }
 0x190   : > { %v404_v13 = vsel %vm397_vm2, %v735_v12, 0.0 }
 0x191   : > { %405 = vadd.xlane.f32.xlu0 %v404_v13 }
 0x21e   : > { %v406_v16 = vpop.xlane.xlu0 %405 }
 0x21f   : > { %736 = vrcp.f32 %v406_v16 }
 0x229   : > { %v737_v17 = vpop.eup %736 }
 0x22a   : > { %v408_v18 = vmul.f32 %v737_v17, %v735_v12 }
 0x22c   : > { %v409_v19 = vpack.c.bf16 %v408_v18, %v408_v18 }
 0x22e   : > { %411 = vst.msk [vmem:[%s345_s10] sm:$0xf] %vm410_vm4, %v409_v19  ;;  %689 = vmatmul.mubr.msk.bf16.vlgmr.msra.gmra.mrb[0].mxu1 %vm397_vm2, %v409_v19 }
 0x301   : > { %v453_v20 = vpop.f32.mrb[0].mxu1 }
 0x302   : > { %v459_v21 = vpack.c.bf16 %v453_v20, %v453_v20  ;;  %v690_v22 = vpop.f32.mrb[1].mxu1 }
 0x303   : > { %v456_v23 = vpop.f32.mrb[2].mxu1 }
 0x304   : > { %461 = vst.msk [vmem:[%s334_s13] sm:$0xf] %vm460_vm5, %v459_v21  ;;  %v691_v24 = vpop.f32.mrb[3].mxu1 }
 0x305 PF: > { %s15_s19 = sadd.s32 1, %s776_s19   ;;  %s880_s15 = smov %s768_s17 }
 0x306   : > { %p12_p7 = scmp.ge.s32.totalorder %s15_s19, 18   ;;  %s881_s16 = smov %s772_s18 }
 0x307   : > { %s882_s17 = smov %s885_s20  ;;  %s883_s18 = smov %s889_s21 }
 0x308   :  { %14 = sbr.rel (!%p12_p7) target bundleno = 3 (0x3), region = 80 }

// kernel: multi_head_attention.5
= control target key start
LH: loop header
LB: loop body
LE: loop exit
PB: predicated region body
PF: predicated region fallthrough
CT: control target
= control target key end

     0   :  { %s2031_s0 = inlined_call_operand.vmem [shape: bf16[16,512], index: 0, kind: input, shape index: {}]   ;;  %s2032_s1 = inlined_call_operand.vmem [shape: bf16[16,512], index: 1, kind: input, shape index: {}]   ;;  %s2033_s2 = inlined_call_operand.vmem [shape: bf16[512,512], index: 2, kind: input, shape index: {}]   ;;  %s2034_s3 = inlined_call_operand.vmem [shape: f32[1,512], index: 3, kind: input, shape index: {}]   ;;  %s2035_s4 = inlined_call_operand.vmem [shape: f32[1,512], index: 4, kind: input, shape index: {}]   ;;  %s2036_s5 = inlined_call_operand.vmem [shape: f32[1,512], index: 5, kind: input, shape index: {}]   ;;  %s2037_s6 = inlined_call_operand.hbm [shape: f32[16,512], index: 6, kind: output, shape index: {}]  }
   0x1   :  { %v1318_v0 = vld [vmem:[%s2033_s2 + $0x4] ss:$16 sps:$4 sm:$0xff]   ;;  %v1320_v1 = vld [vmem:[%s2033_s2 + $0xc] ss:$16 sps:$4 sm:$0xff]   ;;  %v1322_v2 = vld [vmem:[%s2033_s2] ss:$16 sps:$4 sm:$0xff]  }
   0x2   :  { %838 = vmatprep.subr.bf16.mxu0 %v1318_v0  ;;  %v1323_v3 = vld [vmem:[%s2033_s2 + $0x8] ss:$16 sps:$4 sm:$0xff]   ;;  %924 = vmatprep.subr.bf16.mxu1 %v1320_v1  ;;  %v1324_v4 = vld [vmem:[%s2033_s2 + $0x24] ss:$16 sps:$4 sm:$0xff]   ;;  %v1326_v5 = vld [vmem:[%s2033_s2 + $0x2c] ss:$16 sps:$4 sm:$0xff]  }
   0x3   :  { %839 = vmatpush1.bf16.msra.mxu0 %v1322_v2  ;;  %925 = vmatpush1.bf16.msra.mxu1 %v1323_v3  ;;  %v1328_v6 = vld [vmem:[%s2033_s2 + $0x20] ss:$16 sps:$4 sm:$0xff]   ;;  %v1329_v7 = vld [vmem:[%s2033_s2 + $0x28] ss:$16 sps:$4 sm:$0xff]   ;;  %v1330_v8 = vld [vmem:[%s2033_s2 + $0x44] ss:$16 sps:$4 sm:$0xff]  }
   0x4   :  { %840 = vmatprep.subr.bf16.mxu0 %v1324_v4  ;;  %926 = vmatprep.subr.bf16.mxu1 %v1326_v5  ;;  %v1332_v9 = vld [vmem:[%s2033_s2 + $0x4c] ss:$16 sps:$4 sm:$0xff]   ;;  %v1334_v10 = vld [vmem:[%s2033_s2 + $0x40] ss:$16 sps:$4 sm:$0xff]   ;;  %v1335_v11 = vld [vmem:[%s2033_s2 + $0x48] ss:$16 sps:$4 sm:$0xff]  }
   0x5   :  { %v1336_v12 = vld [vmem:[%s2033_s2 + $0x64] ss:$16 sps:$4 sm:$0xff]   ;;  %v1338_v13 = vld [vmem:[%s2033_s2 + $0x6c] ss:$16 sps:$4 sm:$0xff]   ;;  %v1340_v14 = vld [vmem:[%s2033_s2 + $0x60] ss:$16 sps:$4 sm:$0xff]  }
   0x6   :  { %v1341_v15 = vld [vmem:[%s2033_s2 + $0x68] ss:$16 sps:$4 sm:$0xff]   ;;  %v1342_v16 = vld [vmem:[%s2033_s2 + $0x84] ss:$16 sps:$4 sm:$0xff]   ;;  %v1344_v17 = vld [vmem:[%s2033_s2 + $0x8c] ss:$16 sps:$4 sm:$0xff]  }
   0x7   :  { %841 = vmatpush1.bf16.msra.mxu0 %v1328_v6  ;;  %927 = vmatpush1.bf16.msra.mxu1 %v1329_v7  ;;  %v1346_v18 = vld [vmem:[%s2033_s2 + $0x80] ss:$16 sps:$4 sm:$0xff]   ;;  %v1347_v19 = vld [vmem:[%s2033_s2 + $0x88] ss:$16 sps:$4 sm:$0xff]   ;;  %v1348_v20 = vld [vmem:[%s2033_s2 + $0xa4] ss:$16 sps:$4 sm:$0xff]  }
   0x8   :  { %842 = vmatprep.subr.bf16.mxu0 %v1330_v8  ;;  %928 = vmatprep.subr.bf16.mxu1 %v1332_v9  ;;  %v1350_v21 = vld [vmem:[%s2033_s2 + $0xac] ss:$16 sps:$4 sm:$0xff]   ;;  %v1352_v22 = vld [vmem:[%s2033_s2 + $0xa0] ss:$16 sps:$4 sm:$0xff]   ;;  %v1353_v23 = vld [vmem:[%s2033_s2 + $0xa8] ss:$16 sps:$4 sm:$0xff]  }
   0x9   :  { %v1354_v24 = vld [vmem:[%s2033_s2 + $0xc4] ss:$16 sps:$4 sm:$0xff]   ;;  %v1356_v25 = vld [vmem:[%s2033_s2 + $0xcc] ss:$16 sps:$4 sm:$0xff]   ;;  %v1358_v26 = vld [vmem:[%s2033_s2 + $0xc0] ss:$16 sps:$4 sm:$0xff]  }
   0xa   :  { %v1359_v27 = vld [vmem:[%s2033_s2 + $0xc8] ss:$16 sps:$4 sm:$0xff]   ;;  %v1360_v28 = vld [vmem:[%s2033_s2 + $0xe4] ss:$16 sps:$4 sm:$0xff]   ;;  %v1362_v29 = vld [vmem:[%s2033_s2 + $0xec] ss:$16 sps:$4 sm:$0xff]  }
   0xb   :  { %843 = vmatpush1.bf16.msra.mxu0 %v1334_v10  ;;  %929 = vmatpush1.bf16.msra.mxu1 %v1335_v11  ;;  %v1364_v30 = vld [vmem:[%s2033_s2 + $0xe0] ss:$16 sps:$4 sm:$0xff]   ;;  %v1365_v31 = vld [vmem:[%s2033_s2 + $0xe8] ss:$16 sps:$4 sm:$0xff]   ;;  %v1366_v32 = vld [vmem:[%s2033_s2 + $0x104] ss:$16 sps:$4 sm:$0xff]  }
   0xc   :  { %844 = vmatprep.subr.bf16.mxu0 %v1336_v12  ;;  %930 = vmatprep.subr.bf16.mxu1 %v1338_v13  ;;  %v1368_v33 = vld [vmem:[%s2033_s2 + $0x10c] ss:$16 sps:$4 sm:$0xff]   ;;  %v1370_v34 = vld [vmem:[%s2033_s2 + $0x100] ss:$16 sps:$4 sm:$0xff]   ;;  %v1371_v35 = vld [vmem:[%s2033_s2 + $0x108] ss:$16 sps:$4 sm:$0xff]  }
   0xd   :  { %v1372_v36 = vld [vmem:[%s2033_s2 + $0x124] ss:$16 sps:$4 sm:$0xff]   ;;  %v1374_v37 = vld [vmem:[%s2033_s2 + $0x12c] ss:$16 sps:$4 sm:$0xff]   ;;  %v1376_v38 = vld [vmem:[%s2033_s2 + $0x120] ss:$16 sps:$4 sm:$0xff]  }
   0xe   :  { %v1377_v39 = vld [vmem:[%s2033_s2 + $0x128] ss:$16 sps:$4 sm:$0xff]   ;;  %v1378_v40 = vld [vmem:[%s2033_s2 + $0x144] ss:$16 sps:$4 sm:$0xff]   ;;  %v1380_v41 = vld [vmem:[%s2033_s2 + $0x14c] ss:$16 sps:$4 sm:$0xff]  }
   0xf   :  { %845 = vmatpush1.bf16.msra.mxu0 %v1340_v14  ;;  %931 = vmatpush1.bf16.msra.mxu1 %v1341_v15  ;;  %v1382_v42 = vld [vmem:[%s2033_s2 + $0x140] ss:$16 sps:$4 sm:$0xff]   ;;  %v1383_v43 = vld [vmem:[%s2033_s2 + $0x148] ss:$16 sps:$4 sm:$0xff]   ;;  %v1384_v44 = vld [vmem:[%s2033_s2 + $0x164] ss:$16 sps:$4 sm:$0xff]  }
  0x10   :  { %846 = vmatprep.subr.bf16.mxu0 %v1342_v16  ;;  %932 = vmatprep.subr.bf16.mxu1 %v1344_v17  ;;  %v1386_v45 = vld [vmem:[%s2033_s2 + $0x16c] ss:$16 sps:$4 sm:$0xff]   ;;  %v1388_v46 = vld [vmem:[%s2033_s2 + $0x160] ss:$16 sps:$4 sm:$0xff]   ;;  %v1389_v47 = vld [vmem:[%s2033_s2 + $0x168] ss:$16 sps:$4 sm:$0xff]  }
  0x11   :  { %v1416_v48 = vld [vmem:[%s2031_s0 + $0x4] ss:$16 sps:$4 sm:$0xff]   ;;  %v1392_v50 = vld [vmem:[%s2033_s2 + $0x18c] ss:$16 sps:$4 sm:$0xff]   ;;  %v1394_v51 = vld [vmem:[%s2033_s2 + $0x180] ss:$16 sps:$4 sm:$0xff]  }
  0x12   :  { %v1390_v49 = vld [vmem:[%s2033_s2 + $0x184] ss:$16 sps:$4 sm:$0xff]   ;;  %870 = vmatprep.mubr.bf16.mxu0 %v1416_v48  ;;  %956 = vmatprep.mubr.bf16.mxu1 %v1416_v48  ;;  %v1395_v52 = vld [vmem:[%s2033_s2 + $0x188] ss:$16 sps:$4 sm:$0xff]   ;;  %v1398_v54 = vld [vmem:[%s2033_s2 + $0x1ac] ss:$16 sps:$4 sm:$0xff]  }
  0x13   :  { %847 = vmatpush1.bf16.msra.mxu0 %v1346_v18  ;;  %933 = vmatpush1.bf16.msra.mxu1 %v1347_v19  ;;  %v1396_v53 = vld [vmem:[%s2033_s2 + $0x1a4] ss:$16 sps:$4 sm:$0xff]   ;;  %v1400_v55 = vld [vmem:[%s2033_s2 + $0x1a0] ss:$16 sps:$4 sm:$0xff]   ;;  %v1401_v56 = vld [vmem:[%s2033_s2 + $0x1a8] ss:$16 sps:$4 sm:$0xff]  }
  0x14   :  { %848 = vmatprep.subr.bf16.mxu0 %v1348_v20  ;;  %934 = vmatprep.subr.bf16.mxu1 %v1350_v21  ;;  %v1402_v57 = vld [vmem:[%s2033_s2 + $0x1c4] ss:$16 sps:$4 sm:$0xff]   ;;  %v1404_v58 = vld [vmem:[%s2033_s2 + $0x1cc] ss:$16 sps:$4 sm:$0xff]   ;;  %v1406_v59 = vld [vmem:[%s2033_s2 + $0x1c0] ss:$16 sps:$4 sm:$0xff]  }
  0x15   :  { %v1407_v60 = vld [vmem:[%s2033_s2 + $0x1c8] ss:$16 sps:$4 sm:$0xff]   ;;  %v1408_v61 = vld [vmem:[%s2033_s2 + $0x1e4] ss:$16 sps:$4 sm:$0xff]   ;;  %v1410_v62 = vld [vmem:[%s2033_s2 + $0x1ec] ss:$16 sps:$4 sm:$0xff]  }
  0x16   :  { %v1412_v63 = vld [vmem:[%s2033_s2 + $0x1e0] ss:$16 sps:$4 sm:$0xff]   ;;  %v1413_v0 = vld [vmem:[%s2033_s2 + $0x1e8] ss:$16 sps:$4 sm:$0xff]   ;;  %v1419_v1 = vld [vmem:[%s2033_s2 + $0x204] ss:$16 sps:$4 sm:$0xff]  }
  0x17   :  { %849 = vmatpush1.bf16.msra.mxu0 %v1352_v22  ;;  %935 = vmatpush1.bf16.msra.mxu1 %v1353_v23  ;;  %v1422_v2 = vld [vmem:[%s2033_s2 + $0x20c] ss:$16 sps:$4 sm:$0xff]   ;;  %v1414_v3 = vld [vmem:[%s2031_s0] ss:$16 sps:$4 sm:$0xff]   ;;  %v1420_v5 = vld [vmem:[%s2033_s2 + $0x208] ss:$16 sps:$4 sm:$0xff]  }
  0x18   :  { %850 = vmatprep.subr.bf16.mxu0 %v1354_v24  ;;  %936 = vmatprep.subr.bf16.mxu1 %v1356_v25  ;;  %v1417_v4 = vld [vmem:[%s2033_s2 + $0x200] ss:$16 sps:$4 sm:$0xff]   ;;  %v1425_v6 = vld [vmem:[%s2033_s2 + $0x224] ss:$16 sps:$4 sm:$0xff]   ;;  %v1428_v7 = vld [vmem:[%s2033_s2 + $0x22c] ss:$16 sps:$4 sm:$0xff]  }
  0x19   :  { %v1423_v8 = vld [vmem:[%s2033_s2 + $0x220] ss:$16 sps:$4 sm:$0xff]   ;;  %v1426_v9 = vld [vmem:[%s2033_s2 + $0x228] ss:$16 sps:$4 sm:$0xff]   ;;  %v1431_v10 = vld [vmem:[%s2033_s2 + $0x244] ss:$16 sps:$4 sm:$0xff]  }
  0x1a   :  { %v1434_v11 = vld [vmem:[%s2033_s2 + $0x24c] ss:$16 sps:$4 sm:$0xff]   ;;  %v1429_v12 = vld [vmem:[%s2033_s2 + $0x240] ss:$16 sps:$4 sm:$0xff]   ;;  %v1432_v13 = vld [vmem:[%s2033_s2 + $0x248] ss:$16 sps:$4 sm:$0xff]  }
  0x1b   :  { %851 = vmatpush1.bf16.msra.mxu0 %v1358_v26  ;;  %937 = vmatpush1.bf16.msra.mxu1 %v1359_v27  ;;  %v1437_v14 = vld [vmem:[%s2033_s2 + $0x264] ss:$16 sps:$4 sm:$0xff]   ;;  %v1440_v15 = vld [vmem:[%s2033_s2 + $0x26c] ss:$16 sps:$4 sm:$0xff]   ;;  %v1435_v16 = vld [vmem:[%s2033_s2 + $0x260] ss:$16 sps:$4 sm:$0xff]  }
  0x1c   :  { %852 = vmatprep.subr.bf16.mxu0 %v1360_v28  ;;  %938 = vmatprep.subr.bf16.mxu1 %v1362_v29  ;;  %v1438_v17 = vld [vmem:[%s2033_s2 + $0x268] ss:$16 sps:$4 sm:$0xff]   ;;  %v1443_v18 = vld [vmem:[%s2033_s2 + $0x284] ss:$16 sps:$4 sm:$0xff]   ;;  %v1446_v19 = vld [vmem:[%s2033_s2 + $0x28c] ss:$16 sps:$4 sm:$0xff]  }
  0x1d   :  { %v1441_v20 = vld [vmem:[%s2033_s2 + $0x280] ss:$16 sps:$4 sm:$0xff]   ;;  %v1444_v21 = vld [vmem:[%s2033_s2 + $0x288] ss:$16 sps:$4 sm:$0xff]   ;;  %v1449_v22 = vld [vmem:[%s2033_s2 + $0x2a4] ss:$16 sps:$4 sm:$0xff]  }
  0x1e   :  { %v1452_v23 = vld [vmem:[%s2033_s2 + $0x2ac] ss:$16 sps:$4 sm:$0xff]   ;;  %v1447_v24 = vld [vmem:[%s2033_s2 + $0x2a0] ss:$16 sps:$4 sm:$0xff]   ;;  %v1450_v25 = vld [vmem:[%s2033_s2 + $0x2a8] ss:$16 sps:$4 sm:$0xff]  }
  0x1f   :  { %853 = vmatpush1.bf16.msra.mxu0 %v1364_v30  ;;  %939 = vmatpush1.bf16.msra.mxu1 %v1365_v31  ;;  %v1455_v26 = vld [vmem:[%s2033_s2 + $0x2c4] ss:$16 sps:$4 sm:$0xff]   ;;  %v1458_v27 = vld [vmem:[%s2033_s2 + $0x2cc] ss:$16 sps:$4 sm:$0xff]   ;;  %v1453_v29 = vld [vmem:[%s2033_s2 + $0x2c0] ss:$16 sps:$4 sm:$0xff]  }
  0x20   :  { %854 = vmatprep.subr.bf16.mxu0 %v1366_v32  ;;  %940 = vmatprep.subr.bf16.mxu1 %v1368_v33  ;;  %v1515_v28 = vld [vmem:[%s2031_s0 + $0xc] ss:$16 sps:$4 sm:$0xff]   ;;  %v1456_v30 = vld [vmem:[%s2033_s2 + $0x2c8] ss:$16 sps:$4 sm:$0xff]  }
  0x23   :  { %855 = vmatpush1.bf16.msra.mxu0 %v1370_v34  ;;  %941 = vmatpush1.bf16.msra.mxu1 %v1371_v35 }
  0x24   :  { %856 = vmatprep.subr.bf16.mxu0 %v1372_v36  ;;  %942 = vmatprep.subr.bf16.mxu1 %v1374_v37 }
  0x27   :  { %857 = vmatpush1.bf16.msra.mxu0 %v1376_v38  ;;  %943 = vmatpush1.bf16.msra.mxu1 %v1377_v39 }
  0x28   :  { %858 = vmatprep.subr.bf16.mxu0 %v1378_v40  ;;  %944 = vmatprep.subr.bf16.mxu1 %v1380_v41 }
  0x2b   :  { %859 = vmatpush1.bf16.msra.mxu0 %v1382_v42  ;;  %945 = vmatpush1.bf16.msra.mxu1 %v1383_v43 }
  0x2c   :  { %860 = vmatprep.subr.bf16.mxu0 %v1384_v44  ;;  %946 = vmatprep.subr.bf16.mxu1 %v1386_v45 }
  0x2f   :  { %861 = vmatpush1.bf16.msra.mxu0 %v1388_v46  ;;  %947 = vmatpush1.bf16.msra.mxu1 %v1389_v47 }
  0x30   :  { %862 = vmatprep.subr.bf16.mxu0 %v1390_v49  ;;  %948 = vmatprep.subr.bf16.mxu1 %v1392_v50 }
  0x33   :  { %863 = vmatpush1.bf16.msra.mxu0 %v1394_v51  ;;  %949 = vmatpush1.bf16.msra.mxu1 %v1395_v52 }
  0x34   :  { %864 = vmatprep.subr.bf16.mxu0 %v1396_v53  ;;  %950 = vmatprep.subr.bf16.mxu1 %v1398_v54 }
  0x37   :  { %865 = vmatpush1.bf16.msra.mxu0 %v1400_v55  ;;  %951 = vmatpush1.bf16.msra.mxu1 %v1401_v56 }
  0x38   :  { %866 = vmatprep.subr.bf16.mxu0 %v1402_v57  ;;  %952 = vmatprep.subr.bf16.mxu1 %v1404_v58 }
  0x3b   :  { %867 = vmatpush1.bf16.msra.mxu0 %v1406_v59  ;;  %953 = vmatpush1.bf16.msra.mxu1 %v1407_v60 }
  0x3c   :  { %868 = vmatprep.subr.bf16.mxu0 %v1408_v61  ;;  %954 = vmatprep.subr.bf16.mxu1 %v1410_v62 }
  0x3f   :  { %869 = vmatpush1.bf16.msra.mxu0 %v1412_v63  ;;  %955 = vmatpush1.bf16.msra.mxu1 %v1413_v0 }
  0x40   :  { %881 = vmatprep.subr.bf16.mxu0 %v1419_v1  ;;  %967 = vmatprep.subr.bf16.mxu1 %v1422_v2 }
  0x42   :  { %871 = vmatmul.mubr.bf16.vlgmr.msra.gmra.mrb[0].mxu0 %v1414_v3  ;;  %957 = vmatmul.mubr.bf16.vlgmr.msra.gmra.mrb[0].mxu1 %v1414_v3 }
  0x43   :  { %882 = vmatpush1.bf16.msra.mxu0 %v1417_v4  ;;  %968 = vmatpush1.bf16.msra.mxu1 %v1420_v5 }
  0x44   :  { %883 = vmatprep.subr.bf16.mxu0 %v1425_v6  ;;  %969 = vmatprep.subr.bf16.mxu1 %v1428_v7 }
  0x47   :  { %884 = vmatpush1.bf16.msra.mxu0 %v1423_v8  ;;  %970 = vmatpush1.bf16.msra.mxu1 %v1426_v9 }
  0x48   :  { %885 = vmatprep.subr.bf16.mxu0 %v1431_v10  ;;  %971 = vmatprep.subr.bf16.mxu1 %v1434_v11 }
  0x4b   :  { %886 = vmatpush1.bf16.msra.mxu0 %v1429_v12  ;;  %972 = vmatpush1.bf16.msra.mxu1 %v1432_v13 }
  0x4c   :  { %887 = vmatprep.subr.bf16.mxu0 %v1437_v14  ;;  %973 = vmatprep.subr.bf16.mxu1 %v1440_v15 }
  0x4f   :  { %888 = vmatpush1.bf16.msra.mxu0 %v1435_v16  ;;  %974 = vmatpush1.bf16.msra.mxu1 %v1438_v17 }
  0x50   :  { %889 = vmatprep.subr.bf16.mxu0 %v1443_v18  ;;  %975 = vmatprep.subr.bf16.mxu1 %v1446_v19 }
  0x53   :  { %890 = vmatpush1.bf16.msra.mxu0 %v1441_v20  ;;  %976 = vmatpush1.bf16.msra.mxu1 %v1444_v21 }
  0x54   :  { %891 = vmatprep.subr.bf16.mxu0 %v1449_v22  ;;  %977 = vmatprep.subr.bf16.mxu1 %v1452_v23 }
  0x57   :  { %892 = vmatpush1.bf16.msra.mxu0 %v1447_v24  ;;  %978 = vmatpush1.bf16.msra.mxu1 %v1450_v25 }
  0x58   :  { %11 = vsyncpa [#allocation3], 0  ;;  %893 = vmatprep.subr.bf16.mxu0 %v1455_v26  ;;  %979 = vmatprep.subr.bf16.mxu1 %v1458_v27  ;;  %v1461_v31 = vld [vmem:[%s2033_s2 + $0x2e4] ss:$16 sps:$4 sm:$0xff]   ;;  %v1464_v32 = vld [vmem:[%s2033_s2 + $0x2ec] ss:$16 sps:$4 sm:$0xff]   ;;  %v158_v4 = vlaneseq }
  0x59   :  { %913 = vmatprep.mubr.bf16.mxu0 %v1515_v28  ;;  %999 = vmatprep.mubr.bf16.mxu1 %v1515_v28  ;;  %v1459_v33 = vld [vmem:[%s2033_s2 + $0x2e0] ss:$16 sps:$4 sm:$0xff]   ;;  %v1462_v34 = vld [vmem:[%s2033_s2 + $0x2e8] ss:$16 sps:$4 sm:$0xff]   ;;  %v1467_v35 = vld [vmem:[%s2033_s2 + $0x304] ss:$16 sps:$4 sm:$0xff]  }
  0x5a   :  { %v1470_v36 = vld [vmem:[%s2033_s2 + $0x30c] ss:$16 sps:$4 sm:$0xff]   ;;  %v1465_v37 = vld [vmem:[%s2033_s2 + $0x300] ss:$16 sps:$4 sm:$0xff]   ;;  %v1468_v38 = vld [vmem:[%s2033_s2 + $0x308] ss:$16 sps:$4 sm:$0xff]  }
  0x5b   :  { %894 = vmatpush1.bf16.msra.mxu0 %v1453_v29  ;;  %980 = vmatpush1.bf16.msra.mxu1 %v1456_v30  ;;  %v1473_v39 = vld [vmem:[%s2033_s2 + $0x324] ss:$16 sps:$4 sm:$0xff]   ;;  %v1476_v40 = vld [vmem:[%s2033_s2 + $0x32c] ss:$16 sps:$4 sm:$0xff]   ;;  %v1471_v41 = vld [vmem:[%s2033_s2 + $0x320] ss:$16 sps:$4 sm:$0xff]  }
  0x5c   :  { %895 = vmatprep.subr.bf16.mxu0 %v1461_v31  ;;  %981 = vmatprep.subr.bf16.mxu1 %v1464_v32  ;;  %v1474_v42 = vld [vmem:[%s2033_s2 + $0x328] ss:$16 sps:$4 sm:$0xff]   ;;  %v1479_v43 = vld [vmem:[%s2033_s2 + $0x344] ss:$16 sps:$4 sm:$0xff]   ;;  %v1482_v44 = vld [vmem:[%s2033_s2 + $0x34c] ss:$16 sps:$4 sm:$0xff]  }
  0x5d   :  { %v1477_v45 = vld [vmem:[%s2033_s2 + $0x340] ss:$16 sps:$4 sm:$0xff]   ;;  %v1480_v46 = vld [vmem:[%s2033_s2 + $0x348] ss:$16 sps:$4 sm:$0xff]   ;;  %v1485_v47 = vld [vmem:[%s2033_s2 + $0x364] ss:$16 sps:$4 sm:$0xff]  }
  0x5e   :  { %v1488_v48 = vld [vmem:[%s2033_s2 + $0x36c] ss:$16 sps:$4 sm:$0xff]   ;;  %v1483_v49 = vld [vmem:[%s2033_s2 + $0x360] ss:$16 sps:$4 sm:$0xff]   ;;  %v1486_v50 = vld [vmem:[%s2033_s2 + $0x368] ss:$16 sps:$4 sm:$0xff]  }
  0x5f   :  { %896 = vmatpush1.bf16.msra.mxu0 %v1459_v33  ;;  %982 = vmatpush1.bf16.msra.mxu1 %v1462_v34  ;;  %v1491_v51 = vld [vmem:[%s2033_s2 + $0x384] ss:$16 sps:$4 sm:$0xff]   ;;  %v1494_v52 = vld [vmem:[%s2033_s2 + $0x38c] ss:$16 sps:$4 sm:$0xff]   ;;  %v1489_v53 = vld [vmem:[%s2033_s2 + $0x380] ss:$16 sps:$4 sm:$0xff]  }
  0x60   :  { %897 = vmatprep.subr.bf16.mxu0 %v1467_v35  ;;  %983 = vmatprep.subr.bf16.mxu1 %v1470_v36  ;;  %v1492_v54 = vld [vmem:[%s2033_s2 + $0x388] ss:$16 sps:$4 sm:$0xff]   ;;  %v1497_v55 = vld [vmem:[%s2033_s2 + $0x3a4] ss:$16 sps:$4 sm:$0xff]   ;;  %v1500_v56 = vld [vmem:[%s2033_s2 + $0x3ac] ss:$16 sps:$4 sm:$0xff]  }
  0x61   :  { %v1495_v57 = vld [vmem:[%s2033_s2 + $0x3a0] ss:$16 sps:$4 sm:$0xff]   ;;  %v1498_v58 = vld [vmem:[%s2033_s2 + $0x3a8] ss:$16 sps:$4 sm:$0xff]   ;;  %v1503_v59 = vld [vmem:[%s2033_s2 + $0x3c4] ss:$16 sps:$4 sm:$0xff]  }
  0x62   :  { %v1506_v60 = vld [vmem:[%s2033_s2 + $0x3cc] ss:$16 sps:$4 sm:$0xff]   ;;  %v1501_v61 = vld [vmem:[%s2033_s2 + $0x3c0] ss:$16 sps:$4 sm:$0xff]   ;;  %v1504_v62 = vld [vmem:[%s2033_s2 + $0x3c8] ss:$16 sps:$4 sm:$0xff]  }
  0x63   :  { %898 = vmatpush1.bf16.msra.mxu0 %v1465_v37  ;;  %984 = vmatpush1.bf16.msra.mxu1 %v1468_v38  ;;  %v1509_v63 = vld [vmem:[%s2033_s2 + $0x3e4] ss:$16 sps:$4 sm:$0xff]   ;;  %v1512_v0 = vld [vmem:[%s2033_s2 + $0x3ec] ss:$16 sps:$4 sm:$0xff]   ;;  %v1507_v1 = vld [vmem:[%s2033_s2 + $0x3e0] ss:$16 sps:$4 sm:$0xff]  }
  0x64   :  { %899 = vmatprep.subr.bf16.mxu0 %v1473_v39  ;;  %985 = vmatprep.subr.bf16.mxu1 %v1476_v40  ;;  %v1510_v2 = vld [vmem:[%s2033_s2 + $0x3e8] ss:$16 sps:$4 sm:$0xff]   ;;  %v159_v5 = vshrl.u32 %v158_v4, 7  ;;  %v156_v7 = vld [vmem:[%s2034_s3] sm:$0xf]  ;;  %v1012_v15 = vld [vmem:[%s2032_s1 + $0x10] sm:$0xff] }
  0x65   :  { %v1513_v3 = vld [vmem:[%s2031_s0 + $0x8] ss:$16 sps:$4 sm:$0xff]   ;;  %v1010_v10 = vld [vmem:[%s2032_s1] sm:$0xff]  ;;  %v1018_v26 = vunpack.c.l.bf16 %v1012_v15  ;;  %v1019_v32 = vunpack.c.h.bf16 %v1012_v15 }
  0x66   :  { %v1978_v6 = vsub.s32 0, %v159_v5  ;;  %v1983_v8 = vsub.s32 2, %v159_v5  ;;  %v1985_v9 = vsub.s32 1, %v159_v5  ;;  %v1990_v11 = vsub.s32 3, %v159_v5  ;;  %v1011_v17 = vld [vmem:[%s2032_s1 + $0x8] sm:$0xff]  ;;  %v1013_v22 = vld [vmem:[%s2032_s1 + $0x18] sm:$0xff] }
  0x67   :  { %900 = vmatpush1.bf16.msra.mxu0 %v1471_v41  ;;  %986 = vmatpush1.bf16.msra.mxu1 %v1474_v42  ;;  %v1014_v16 = vunpack.c.l.bf16 %v1010_v10  ;;  %v1015_v20 = vunpack.c.h.bf16 %v1010_v10  ;;  %v1016_v28 = vunpack.c.l.bf16 %v1011_v17  ;;  %v1020_v35 = vunpack.c.l.bf16 %v1013_v22 }
  0x68   :  { %901 = vmatprep.subr.bf16.mxu0 %v1479_v43  ;;  %987 = vmatprep.subr.bf16.mxu1 %v1482_v44  ;;  %v161_v12 = vrot.slane %v156_v7, %v1978_v6  ;;  %v169_v13 = vrot.slane %v156_v7, %v1983_v8  ;;  %v165_v14 = vrot.slane %v156_v7, %v1985_v9  ;;  %v1017_v38 = vunpack.c.h.bf16 %v1011_v17 }
  0x69   :  { %v173_v21 = vrot.slane %v156_v7, %v1990_v11 }
  0x6b   :  { %902 = vmatpush1.bf16.msra.mxu0 %v1477_v45  ;;  %988 = vmatpush1.bf16.msra.mxu1 %v1480_v46 }
  0x6c   :  { %903 = vmatprep.subr.bf16.mxu0 %v1485_v47  ;;  %989 = vmatprep.subr.bf16.mxu1 %v1488_v48  ;;  %v1021_v48 = vunpack.c.h.bf16 %v1013_v22 }
  0x6f   :  { %904 = vmatpush1.bf16.msra.mxu0 %v1483_v49  ;;  %990 = vmatpush1.bf16.msra.mxu1 %v1486_v50 }
  0x70   :  { %905 = vmatprep.subr.bf16.mxu0 %v1491_v51  ;;  %991 = vmatprep.subr.bf16.mxu1 %v1494_v52 }
  0x73   :  { %906 = vmatpush1.bf16.msra.mxu0 %v1489_v53  ;;  %992 = vmatpush1.bf16.msra.mxu1 %v1492_v54 }
  0x74   :  { %907 = vmatprep.subr.bf16.mxu0 %v1497_v55  ;;  %993 = vmatprep.subr.bf16.mxu1 %v1500_v56 }
  0x77   :  { %908 = vmatpush1.bf16.msra.mxu0 %v1495_v57  ;;  %994 = vmatpush1.bf16.msra.mxu1 %v1498_v58 }
  0x78   :  { %909 = vmatprep.subr.bf16.mxu0 %v1503_v59  ;;  %995 = vmatprep.subr.bf16.mxu1 %v1506_v60 }
  0x7b   :  { %910 = vmatpush1.bf16.msra.mxu0 %v1501_v61  ;;  %996 = vmatpush1.bf16.msra.mxu1 %v1504_v62 }
  0x7c   :  { %911 = vmatprep.subr.bf16.mxu0 %v1509_v63  ;;  %997 = vmatprep.subr.bf16.mxu1 %v1512_v0 }
  0x7f   :  { %912 = vmatpush1.bf16.msra.mxu0 %v1507_v1  ;;  %998 = vmatpush1.bf16.msra.mxu1 %v1510_v2 }
  0x82   :  { %914 = vmatmul.mubr.bf16.vlgmr.msra.gmra.mrb[0].mxu0 %v1513_v3  ;;  %1000 = vmatmul.mubr.bf16.vlgmr.msra.gmra.mrb[0].mxu1 %v1513_v3 }
 0x155   :  { %v915_v18 = vpop.f32.mrb[0].mxu0  ;;  %v1001_v19 = vpop.f32.mrb[0].mxu1 }
 0x156   :  { %v1299_v23 = vadd.f32 %v915_v18, %v161_v12  ;;  %v917_v24 = vpop.f32.mrb[1].mxu0  ;;  %v1003_v25 = vpop.f32.mrb[1].mxu1  ;;  %v1303_v27 = vadd.f32 %v1001_v19, %v169_v13 }
 0x157   :  { %v1300_v29 = vadd.f32 %v917_v24, %v165_v14  ;;  %v919_v30 = vpop.f32.mrb[2].mxu0  ;;  %v1005_v31 = vpop.f32.mrb[2].mxu1  ;;  %v1304_v40 = vadd.f32 %v1003_v25, %v173_v21 }
 0x158   :  { %v1022_v33 = vadd.f32 %v1299_v23, %v1014_v16  ;;  %v1301_v34 = vadd.f32 %v919_v30, %v161_v12  ;;  %v921_v36 = vpop.f32.mrb[3].mxu0  ;;  %v1007_v37 = vpop.f32.mrb[3].mxu1  ;;  %v1305_v41 = vadd.f32 %v1005_v31, %v169_v13  ;;  %v1024_v44 = vadd.f32 %v1303_v27, %v1016_v28  ;;  %v1113_v31 = vld [vmem:[%s2036_s5] sm:$0xf] }
 0x159   :  { %v1023_v39 = vadd.f32 %v1300_v29, %v1015_v20  ;;  %v1302_v42 = vadd.f32 %v921_v36, %v165_v14  ;;  %v1306_v47 = vadd.f32 %v1007_v37, %v173_v21  ;;  %v1025_v51 = vadd.f32 %v1304_v40, %v1017_v38  ;;  %v1083_v29 = vld [vmem:[%s2035_s4] sm:$0xf]  ;;  %s1544_s4 = smov [#allocation2]  }
 0x15a   :  { %v1026_v43 = vadd.f32 %v1301_v34, %v1018_v26  ;;  %v1028_v49 = vadd.f32 %v1305_v41, %v1020_v35  ;;  %v1088_v30 = vrot.slane %v1083_v29, %v1978_v6  ;;  %v1100_v34 = vrot.slane %v1083_v29, %v1990_v11  ;;  %s1156_s5 = sshll.u32 %s1544_s4, 4  ;;  %s1157_s5 = int_to_ptr.vmem [resolvable:$true] %s1156_s5 }
 0x15b   :  { %v1027_v45 = vadd.f32 %v1302_v42, %v1019_v32  ;;  %v1030_v46 = vadd.f32 %v1023_v39, %v1022_v33  ;;  %v1029_v55 = vadd.f32 %v1306_v47, %v1021_v48  ;;  %v1096_v32 = vrot.slane %v1083_v29, %v1983_v8  ;;  %s1520_s7 = scalar_lea.vmem %s1157_s5, 1024  ;;  %p1525_p1 = scmp.lt.s32.totalorder %s1157_s5, %s1157_s5 }
 0x15c   :  { %v1118_v40 = vrot.slane %v1113_v31, %v1978_v6  ;;  %v1126_v41 = vrot.slane %v1113_v31, %v1983_v8  ;;  %v1122_v42 = vrot.slane %v1113_v31, %v1985_v9  ;;  %p1521_p0 = scmp.ne.s32.totalorder %s1157_s5, %s1520_s7  ;;  %p1526_p2 = scmp.lt.s32.totalorder %s1520_s7, %s1520_s7 }
 0x15d   :  { %v1035_v50 = vadd.f32 %v1027_v45, %v1026_v43  ;;  %v1031_v52 = vadd.f32 %v1030_v46, %v1024_v44 }
 0x15e   :  { %p1527_p3 = por %p1526_p2, %p1525_p1 }
 0x15f   :  { %v1032_v53 = vadd.f32 %v1031_v52, %v1025_v51  ;;  %v1036_v54 = vadd.f32 %v1035_v50, %v1028_v49 }
 0x160   :  { %p1528_p4 = pnand %p1527_p3, %p1521_p0 }
 0x161   :  { %1033 = vadd.xlane.f32.xlu0 %v1032_v53  ;;  %v1037_v56 = vadd.f32 %v1036_v54, %v1029_v55 }
 0x165   :  { %1038 = vadd.xlane.f32.xlu0 %v1037_v56 }
 0x1ee   :  { %v1034_v57 = vpop.xlane.xlu0 %1033 }
 0x1ef   :  { %v1041_v58 = vmul.f32 0.001953125, %v1034_v57 }
 0x1f1   :  { %v1043_v59 = vsub.f32 %v1022_v33, %v1041_v58  ;;  %v1044_v60 = vsub.f32 %v1023_v39, %v1041_v58  ;;  %v1045_v61 = vsub.f32 %v1024_v44, %v1041_v58  ;;  %v1046_v63 = vsub.f32 %v1025_v51, %v1041_v58 }
 0x1f2   :  { %v1039_v62 = vpop.xlane.xlu0 %1038  ;;  %v1092_v33 = vrot.slane %v1083_v29, %v1985_v9 }
 0x1f3   :  { %v1042_v0 = vmul.f32 0.001953125, %v1039_v62  ;;  %v1051_v1 = vmul.f32 %v1043_v59, %v1043_v59  ;;  %v1052_v2 = vmul.f32 %v1044_v60, %v1044_v60  ;;  %v1053_v3 = vmul.f32 %v1045_v61, %v1045_v61 }
 0x1f4   :  { %v1054_v12 = vmul.f32 %v1046_v63, %v1046_v63 }
 0x1f5   :  { %v1047_v4 = vsub.f32 %v1026_v43, %v1042_v0  ;;  %v1048_v5 = vsub.f32 %v1027_v45, %v1042_v0  ;;  %v1059_v7 = vadd.f32 %v1052_v2, %v1051_v1  ;;  %v1049_v10 = vsub.f32 %v1028_v49, %v1042_v0 }
 0x1f6   :  { %v1050_v14 = vsub.f32 %v1029_v55, %v1042_v0  ;;  %v1130_v43 = vrot.slane %v1113_v31, %v1990_v11 }
 0x1f7   :  { %v1060_v13 = vadd.f32 %v1059_v7, %v1053_v3  ;;  %v1055_v15 = vmul.f32 %v1047_v4, %v1047_v4  ;;  %v1056_v16 = vmul.f32 %v1048_v5, %v1048_v5  ;;  %v1057_v18 = vmul.f32 %v1049_v10, %v1049_v10 }
 0x1f8   :  { %v1058_v20 = vmul.f32 %v1050_v14, %v1050_v14 }
 0x1f9   :  { %v1061_v17 = vadd.f32 %v1060_v13, %v1054_v12  ;;  %v1064_v19 = vadd.f32 %v1056_v16, %v1055_v15 }
 0x1fb   :  { %1062 = vadd.xlane.f32.xlu1 %v1061_v17  ;;  %v1065_v21 = vadd.f32 %v1064_v19, %v1057_v18 }
 0x1fd   :  { %v1066_v22 = vadd.f32 %v1065_v21, %v1058_v20 }
 0x1ff   :  { %1067 = vadd.xlane.f32.xlu1 %v1066_v22 }
 0x288   :  { %v1063_v23 = vpop.xlane.xlu1 %1062 }
 0x289   :  { %v1069_v24 = vmul.f32 0.001953125, %v1063_v23 }
 0x28b   :  { %v1071_v25 = vadd.f32 1e-05, %v1069_v24 }
 0x28c   :  { %v1068_v26 = vpop.xlane.xlu1 %1067 }
 0x28d   :  { %1516 = vrsqrt.f32 %v1071_v25  ;;  %v1070_v27 = vmul.f32 0.001953125, %v1068_v26 }
 0x28f   :  { %v1072_v28 = vadd.f32 1e-05, %v1070_v27 }
 0x291   :  { %1518 = vrsqrt.f32 %v1072_v28 }
 0x297   :  { %v1517_v35 = vpop.eup %1516 }
 0x298   :  { %v1075_v36 = vmul.f32 %v1517_v35, %v1043_v59  ;;  %v1076_v37 = vmul.f32 %v1517_v35, %v1044_v60  ;;  %v1077_v38 = vmul.f32 %v1517_v35, %v1045_v61  ;;  %v1078_v39 = vmul.f32 %v1517_v35, %v1046_v63 }
 0x29a   :  { %v1105_v44 = vmul.f32 %v1088_v30, %v1075_v36  ;;  %v1106_v45 = vmul.f32 %v1092_v33, %v1076_v37  ;;  %v1107_v46 = vmul.f32 %v1096_v32, %v1077_v38  ;;  %v1108_v47 = vmul.f32 %v1100_v34, %v1078_v39 }
 0x29b   :  { %v1519_v48 = vpop.eup %1518 }
 0x29c   :  { %v1079_v49 = vmul.f32 %v1519_v48, %v1047_v4  ;;  %v1080_v50 = vmul.f32 %v1519_v48, %v1048_v5  ;;  %v1081_v51 = vmul.f32 %v1519_v48, %v1049_v10  ;;  %v1082_v52 = vmul.f32 %v1519_v48, %v1050_v14 }
 0x29d   :  { %v1135_v53 = vadd.f32 %v1118_v40, %v1105_v44  ;;  %v1136_v54 = vadd.f32 %v1122_v42, %v1106_v45  ;;  %v1137_v55 = vadd.f32 %v1126_v41, %v1107_v46  ;;  %v1138_v56 = vadd.f32 %v1130_v43, %v1108_v47 }
 0x29e   :  { %v1109_v6 = vmul.f32 %v1088_v30, %v1079_v49  ;;  %v1110_v8 = vmul.f32 %v1092_v33, %v1080_v50  ;;  %v1111_v9 = vmul.f32 %v1096_v32, %v1081_v51  ;;  %v1112_v57 = vmul.f32 %v1100_v34, %v1082_v52 }
 0x29f   :  { %1143 = vst [vmem:[#allocation2] sm:$0xff] %v1135_v53  ;;  %1144 = vst [vmem:[#allocation2 + $0x8] sm:$0xff] %v1136_v54 }
 0x2a0   :  { %1145 = vst [vmem:[#allocation2 + $0x10] sm:$0xff] %v1137_v55  ;;  %1146 = vst [vmem:[#allocation2 + $0x18] sm:$0xff] %v1138_v56  ;;  %v1139_v11 = vadd.f32 %v1118_v40, %v1109_v6  ;;  %v1140_v58 = vadd.f32 %v1122_v42, %v1110_v8  ;;  %v1141_v59 = vadd.f32 %v1126_v41, %v1111_v9 }
 0x2a1   :  { %v1142_v60 = vadd.f32 %v1130_v43, %v1112_v57 }
 0x2a2   :  { %1147 = vst [vmem:[#allocation2 + $0x20] sm:$0xff] %v1139_v11  ;;  %1148 = vst [vmem:[#allocation2 + $0x28] sm:$0xff] %v1140_v58 }
 0x2a3   :  { %1149 = vst [vmem:[#allocation2 + $0x30] sm:$0xff] %v1141_v59  ;;  %1150 = vst [vmem:[#allocation2 + $0x38] sm:$0xff] %v1142_v60 }
 0x2a4   :  { %1531 = shalt.err (!%p1528_p4)
}
 0x2a5   :  { %s1532_s10 = scalar_lea.hbm %s2037_s6, 1024 }
 0x2a6   :  { %p1533_p5 = scmp.ne.s32.totalorder %s2037_s6, %s1532_s10  ;;  %p1536_p6 = scmp.lt.u32.totalorder %s1532_s10, %s2037_s6 }
 0x2a8   :  { %p1538_p7 = pnand %p1536_p6, %p1533_p5 }
 0x2aa   :  { %1541 = shalt.err (!%p1538_p7)
}
 0x2ab   :  { %s1545_s15 = smov 512   ;;  %s1546_s16 = smov 32  }
 0x2ac   :  { %1162 = dma.vmem_to_hbm [thread:$0]  %s1157_s5, 1024, %s2037_s6, [#allocation3], %s1545_s15, %s1545_s15, %s1546_s16  }
 0x2ad   :  { %1542 = dma.done.wait [#allocation3], 1024  }
 0x2ae   :  { %1543 = vsyncadd [#allocation3], 4294966272 }
 0x2af   :  { %1166 = vsyncpa [#allocation3], 1 }

// kernel: multi_head_attention.3
= control target key start
LH: loop header
LB: loop body
LE: loop exit
PB: predicated region body
PF: predicated region fallthrough
CT: control target
= control target key end

     0   :  { %s5464_s3 = inlined_call_operand.vmem [shape: bf16[512,512], index: 3, kind: input, shape index: {}]   ;;  %s5465_s0 = inlined_call_operand.vmem [shape: bf16[16,512], index: 0, kind: input, shape index: {}]   ;;  %s5466_s4 = inlined_call_operand.vmem [shape: bf16[512,512], index: 4, kind: input, shape index: {}]   ;;  %s5467_s1 = inlined_call_operand.vmem [shape: bf16[16,512], index: 1, kind: input, shape index: {}]   ;;  %s5468_s5 = inlined_call_operand.vmem [shape: bf16[512,512], index: 5, kind: input, shape index: {}]   ;;  %s5469_s2 = inlined_call_operand.vmem [shape: bf16[16,512], index: 2, kind: input, shape index: {}]   ;;  %s5470_s6 = inlined_call_operand.vmem [shape: f32[1,512], index: 6, kind: input, shape index: {}]   ;;  %s5471_s9 = inlined_call_operand.vmem [shape: bf16[16,512], index: 9, kind: output, shape index: {0}]   ;;  %s5472_s7 = inlined_call_operand.vmem [shape: f32[1,512], index: 7, kind: input, shape index: {}]   ;;  %s5473_s10 = inlined_call_operand.vmem [shape: bf16[16,512], index: 10, kind: output, shape index: {1}]   ;;  %s5474_s8 = inlined_call_operand.vmem [shape: f32[1,512], index: 8, kind: input, shape index: {}]   ;;  %s5475_s11 = inlined_call_operand.vmem [shape: bf16[16,512], index: 11, kind: output, shape index: {2}]  }
   0x1   :  { %v3557_v0 = vld [vmem:[%s5464_s3 + $0x4] ss:$16 sps:$4 sm:$0xff]   ;;  %v3559_v1 = vld [vmem:[%s5464_s3 + $0xc] ss:$16 sps:$4 sm:$0xff]   ;;  %v3561_v2 = vld [vmem:[%s5464_s3] ss:$16 sps:$4 sm:$0xff]  }
   0x2   :  { %849 = vmatprep.subr.bf16.mxu0 %v3557_v0  ;;  %v3562_v3 = vld [vmem:[%s5464_s3 + $0x8] ss:$16 sps:$4 sm:$0xff]   ;;  %935 = vmatprep.subr.bf16.mxu1 %v3559_v1  ;;  %v3563_v4 = vld [vmem:[%s5464_s3 + $0x24] ss:$16 sps:$4 sm:$0xff]   ;;  %v3565_v5 = vld [vmem:[%s5464_s3 + $0x2c] ss:$16 sps:$4 sm:$0xff]  }
   0x3   :  { %850 = vmatpush1.bf16.msra.mxu0 %v3561_v2  ;;  %936 = vmatpush1.bf16.msra.mxu1 %v3562_v3  ;;  %v3567_v6 = vld [vmem:[%s5464_s3 + $0x20] ss:$16 sps:$4 sm:$0xff]   ;;  %v3568_v7 = vld [vmem:[%s5464_s3 + $0x28] ss:$16 sps:$4 sm:$0xff]   ;;  %v3569_v8 = vld [vmem:[%s5464_s3 + $0x44] ss:$16 sps:$4 sm:$0xff]  }
   0x4   :  { %851 = vmatprep.subr.bf16.mxu0 %v3563_v4  ;;  %937 = vmatprep.subr.bf16.mxu1 %v3565_v5  ;;  %v3571_v9 = vld [vmem:[%s5464_s3 + $0x4c] ss:$16 sps:$4 sm:$0xff]   ;;  %v3573_v10 = vld [vmem:[%s5464_s3 + $0x40] ss:$16 sps:$4 sm:$0xff]   ;;  %v3574_v11 = vld [vmem:[%s5464_s3 + $0x48] ss:$16 sps:$4 sm:$0xff]  }
   0x5   :  { %v3575_v12 = vld [vmem:[%s5464_s3 + $0x64] ss:$16 sps:$4 sm:$0xff]   ;;  %v3577_v13 = vld [vmem:[%s5464_s3 + $0x6c] ss:$16 sps:$4 sm:$0xff]   ;;  %v3579_v14 = vld [vmem:[%s5464_s3 + $0x60] ss:$16 sps:$4 sm:$0xff]  }
   0x6   :  { %v3580_v15 = vld [vmem:[%s5464_s3 + $0x68] ss:$16 sps:$4 sm:$0xff]   ;;  %v3581_v16 = vld [vmem:[%s5464_s3 + $0x84] ss:$16 sps:$4 sm:$0xff]   ;;  %v3583_v17 = vld [vmem:[%s5464_s3 + $0x8c] ss:$16 sps:$4 sm:$0xff]  }
   0x7   :  { %852 = vmatpush1.bf16.msra.mxu0 %v3567_v6  ;;  %938 = vmatpush1.bf16.msra.mxu1 %v3568_v7  ;;  %v3585_v18 = vld [vmem:[%s5464_s3 + $0x80] ss:$16 sps:$4 sm:$0xff]   ;;  %v3586_v19 = vld [vmem:[%s5464_s3 + $0x88] ss:$16 sps:$4 sm:$0xff]   ;;  %v3587_v20 = vld [vmem:[%s5464_s3 + $0xa4] ss:$16 sps:$4 sm:$0xff]  }
   0x8   :  { %853 = vmatprep.subr.bf16.mxu0 %v3569_v8  ;;  %939 = vmatprep.subr.bf16.mxu1 %v3571_v9  ;;  %v3589_v21 = vld [vmem:[%s5464_s3 + $0xac] ss:$16 sps:$4 sm:$0xff]   ;;  %v3591_v22 = vld [vmem:[%s5464_s3 + $0xa0] ss:$16 sps:$4 sm:$0xff]   ;;  %v3592_v23 = vld [vmem:[%s5464_s3 + $0xa8] ss:$16 sps:$4 sm:$0xff]  }
   0x9   :  { %v3593_v24 = vld [vmem:[%s5464_s3 + $0xc4] ss:$16 sps:$4 sm:$0xff]   ;;  %v3595_v25 = vld [vmem:[%s5464_s3 + $0xcc] ss:$16 sps:$4 sm:$0xff]   ;;  %v3597_v26 = vld [vmem:[%s5464_s3 + $0xc0] ss:$16 sps:$4 sm:$0xff]  }
   0xa   :  { %v3598_v27 = vld [vmem:[%s5464_s3 + $0xc8] ss:$16 sps:$4 sm:$0xff]   ;;  %v3599_v28 = vld [vmem:[%s5464_s3 + $0xe4] ss:$16 sps:$4 sm:$0xff]   ;;  %v3601_v29 = vld [vmem:[%s5464_s3 + $0xec] ss:$16 sps:$4 sm:$0xff]  }
   0xb   :  { %854 = vmatpush1.bf16.msra.mxu0 %v3573_v10  ;;  %940 = vmatpush1.bf16.msra.mxu1 %v3574_v11  ;;  %v3603_v30 = vld [vmem:[%s5464_s3 + $0xe0] ss:$16 sps:$4 sm:$0xff]   ;;  %v3604_v31 = vld [vmem:[%s5464_s3 + $0xe8] ss:$16 sps:$4 sm:$0xff]   ;;  %v3605_v32 = vld [vmem:[%s5464_s3 + $0x104] ss:$16 sps:$4 sm:$0xff]  }
   0xc   :  { %855 = vmatprep.subr.bf16.mxu0 %v3575_v12  ;;  %941 = vmatprep.subr.bf16.mxu1 %v3577_v13  ;;  %v3607_v33 = vld [vmem:[%s5464_s3 + $0x10c] ss:$16 sps:$4 sm:$0xff]   ;;  %v3609_v34 = vld [vmem:[%s5464_s3 + $0x100] ss:$16 sps:$4 sm:$0xff]   ;;  %v3610_v35 = vld [vmem:[%s5464_s3 + $0x108] ss:$16 sps:$4 sm:$0xff]  }
   0xd   :  { %v3611_v36 = vld [vmem:[%s5464_s3 + $0x124] ss:$16 sps:$4 sm:$0xff]   ;;  %v3613_v37 = vld [vmem:[%s5464_s3 + $0x12c] ss:$16 sps:$4 sm:$0xff]   ;;  %v3615_v38 = vld [vmem:[%s5464_s3 + $0x120] ss:$16 sps:$4 sm:$0xff]  }
   0xe   :  { %v3616_v39 = vld [vmem:[%s5464_s3 + $0x128] ss:$16 sps:$4 sm:$0xff]   ;;  %v3617_v40 = vld [vmem:[%s5464_s3 + $0x144] ss:$16 sps:$4 sm:$0xff]   ;;  %v3619_v41 = vld [vmem:[%s5464_s3 + $0x14c] ss:$16 sps:$4 sm:$0xff]  }
   0xf   :  { %856 = vmatpush1.bf16.msra.mxu0 %v3579_v14  ;;  %942 = vmatpush1.bf16.msra.mxu1 %v3580_v15  ;;  %v3621_v42 = vld [vmem:[%s5464_s3 + $0x140] ss:$16 sps:$4 sm:$0xff]   ;;  %v3622_v43 = vld [vmem:[%s5464_s3 + $0x148] ss:$16 sps:$4 sm:$0xff]   ;;  %v3623_v44 = vld [vmem:[%s5464_s3 + $0x164] ss:$16 sps:$4 sm:$0xff]  }
  0x10   :  { %857 = vmatprep.subr.bf16.mxu0 %v3581_v16  ;;  %943 = vmatprep.subr.bf16.mxu1 %v3583_v17  ;;  %v3625_v45 = vld [vmem:[%s5464_s3 + $0x16c] ss:$16 sps:$4 sm:$0xff]   ;;  %v3627_v46 = vld [vmem:[%s5464_s3 + $0x160] ss:$16 sps:$4 sm:$0xff]   ;;  %v3628_v47 = vld [vmem:[%s5464_s3 + $0x168] ss:$16 sps:$4 sm:$0xff]  }
  0x11   :  { %v3655_v48 = vld [vmem:[%s5465_s0 + $0x4] ss:$16 sps:$4 sm:$0xff]   ;;  %v3631_v50 = vld [vmem:[%s5464_s3 + $0x18c] ss:$16 sps:$4 sm:$0xff]   ;;  %v3633_v51 = vld [vmem:[%s5464_s3 + $0x180] ss:$16 sps:$4 sm:$0xff]  }
  0x12   :  { %v3629_v49 = vld [vmem:[%s5464_s3 + $0x184] ss:$16 sps:$4 sm:$0xff]   ;;  %881 = vmatprep.mubr.bf16.mxu0 %v3655_v48  ;;  %967 = vmatprep.mubr.bf16.mxu1 %v3655_v48  ;;  %v3634_v52 = vld [vmem:[%s5464_s3 + $0x188] ss:$16 sps:$4 sm:$0xff]   ;;  %v3637_v54 = vld [vmem:[%s5464_s3 + $0x1ac] ss:$16 sps:$4 sm:$0xff]  }
  0x13   :  { %858 = vmatpush1.bf16.msra.mxu0 %v3585_v18  ;;  %944 = vmatpush1.bf16.msra.mxu1 %v3586_v19  ;;  %v3635_v53 = vld [vmem:[%s5464_s3 + $0x1a4] ss:$16 sps:$4 sm:$0xff]   ;;  %v3639_v55 = vld [vmem:[%s5464_s3 + $0x1a0] ss:$16 sps:$4 sm:$0xff]   ;;  %v3640_v56 = vld [vmem:[%s5464_s3 + $0x1a8] ss:$16 sps:$4 sm:$0xff]  }
  0x14   :  { %859 = vmatprep.subr.bf16.mxu0 %v3587_v20  ;;  %945 = vmatprep.subr.bf16.mxu1 %v3589_v21  ;;  %v3641_v57 = vld [vmem:[%s5464_s3 + $0x1c4] ss:$16 sps:$4 sm:$0xff]   ;;  %v3643_v58 = vld [vmem:[%s5464_s3 + $0x1cc] ss:$16 sps:$4 sm:$0xff]   ;;  %v3645_v59 = vld [vmem:[%s5464_s3 + $0x1c0] ss:$16 sps:$4 sm:$0xff]  }
  0x15   :  { %v3646_v60 = vld [vmem:[%s5464_s3 + $0x1c8] ss:$16 sps:$4 sm:$0xff]   ;;  %v3647_v61 = vld [vmem:[%s5464_s3 + $0x1e4] ss:$16 sps:$4 sm:$0xff]   ;;  %v3649_v62 = vld [vmem:[%s5464_s3 + $0x1ec] ss:$16 sps:$4 sm:$0xff]  }
  0x16   :  { %v3651_v63 = vld [vmem:[%s5464_s3 + $0x1e0] ss:$16 sps:$4 sm:$0xff]   ;;  %v3652_v0 = vld [vmem:[%s5464_s3 + $0x1e8] ss:$16 sps:$4 sm:$0xff]   ;;  %v3658_v1 = vld [vmem:[%s5464_s3 + $0x204] ss:$16 sps:$4 sm:$0xff]  }
  0x17   :  { %860 = vmatpush1.bf16.msra.mxu0 %v3591_v22  ;;  %946 = vmatpush1.bf16.msra.mxu1 %v3592_v23  ;;  %v3661_v2 = vld [vmem:[%s5464_s3 + $0x20c] ss:$16 sps:$4 sm:$0xff]   ;;  %v3653_v3 = vld [vmem:[%s5465_s0] ss:$16 sps:$4 sm:$0xff]   ;;  %v3659_v5 = vld [vmem:[%s5464_s3 + $0x208] ss:$16 sps:$4 sm:$0xff]  }
  0x18   :  { %861 = vmatprep.subr.bf16.mxu0 %v3593_v24  ;;  %947 = vmatprep.subr.bf16.mxu1 %v3595_v25  ;;  %v3656_v4 = vld [vmem:[%s5464_s3 + $0x200] ss:$16 sps:$4 sm:$0xff]   ;;  %v3664_v6 = vld [vmem:[%s5464_s3 + $0x224] ss:$16 sps:$4 sm:$0xff]   ;;  %v3667_v7 = vld [vmem:[%s5464_s3 + $0x22c] ss:$16 sps:$4 sm:$0xff]  }
  0x19   :  { %v3662_v8 = vld [vmem:[%s5464_s3 + $0x220] ss:$16 sps:$4 sm:$0xff]   ;;  %v3665_v9 = vld [vmem:[%s5464_s3 + $0x228] ss:$16 sps:$4 sm:$0xff]   ;;  %v3670_v10 = vld [vmem:[%s5464_s3 + $0x244] ss:$16 sps:$4 sm:$0xff]  }
  0x1a   :  { %v3673_v11 = vld [vmem:[%s5464_s3 + $0x24c] ss:$16 sps:$4 sm:$0xff]   ;;  %v3668_v12 = vld [vmem:[%s5464_s3 + $0x240] ss:$16 sps:$4 sm:$0xff]   ;;  %v3671_v13 = vld [vmem:[%s5464_s3 + $0x248] ss:$16 sps:$4 sm:$0xff]  }
  0x1b   :  { %862 = vmatpush1.bf16.msra.mxu0 %v3597_v26  ;;  %948 = vmatpush1.bf16.msra.mxu1 %v3598_v27  ;;  %v3676_v14 = vld [vmem:[%s5464_s3 + $0x264] ss:$16 sps:$4 sm:$0xff]   ;;  %v3679_v15 = vld [vmem:[%s5464_s3 + $0x26c] ss:$16 sps:$4 sm:$0xff]   ;;  %v3674_v16 = vld [vmem:[%s5464_s3 + $0x260] ss:$16 sps:$4 sm:$0xff]  }
  0x1c   :  { %863 = vmatprep.subr.bf16.mxu0 %v3599_v28  ;;  %949 = vmatprep.subr.bf16.mxu1 %v3601_v29  ;;  %v3677_v17 = vld [vmem:[%s5464_s3 + $0x268] ss:$16 sps:$4 sm:$0xff]   ;;  %v3682_v18 = vld [vmem:[%s5464_s3 + $0x284] ss:$16 sps:$4 sm:$0xff]   ;;  %v3685_v19 = vld [vmem:[%s5464_s3 + $0x28c] ss:$16 sps:$4 sm:$0xff]  }
  0x1d   :  { %v3680_v20 = vld [vmem:[%s5464_s3 + $0x280] ss:$16 sps:$4 sm:$0xff]   ;;  %v3683_v21 = vld [vmem:[%s5464_s3 + $0x288] ss:$16 sps:$4 sm:$0xff]   ;;  %v3688_v22 = vld [vmem:[%s5464_s3 + $0x2a4] ss:$16 sps:$4 sm:$0xff]  }
  0x1e   :  { %v3691_v23 = vld [vmem:[%s5464_s3 + $0x2ac] ss:$16 sps:$4 sm:$0xff]   ;;  %v3686_v24 = vld [vmem:[%s5464_s3 + $0x2a0] ss:$16 sps:$4 sm:$0xff]   ;;  %v3689_v25 = vld [vmem:[%s5464_s3 + $0x2a8] ss:$16 sps:$4 sm:$0xff]  }
  0x1f   :  { %864 = vmatpush1.bf16.msra.mxu0 %v3603_v30  ;;  %950 = vmatpush1.bf16.msra.mxu1 %v3604_v31  ;;  %v3694_v26 = vld [vmem:[%s5464_s3 + $0x2c4] ss:$16 sps:$4 sm:$0xff]   ;;  %v3697_v27 = vld [vmem:[%s5464_s3 + $0x2cc] ss:$16 sps:$4 sm:$0xff]   ;;  %v3692_v28 = vld [vmem:[%s5464_s3 + $0x2c0] ss:$16 sps:$4 sm:$0xff]  }
  0x20   :  { %865 = vmatprep.subr.bf16.mxu0 %v3605_v32  ;;  %951 = vmatprep.subr.bf16.mxu1 %v3607_v33  ;;  %v3695_v29 = vld [vmem:[%s5464_s3 + $0x2c8] ss:$16 sps:$4 sm:$0xff]   ;;  %v3754_v30 = vld [vmem:[%s5465_s0 + $0xc] ss:$16 sps:$4 sm:$0xff]   ;;  %v3700_v31 = vld [vmem:[%s5464_s3 + $0x2e4] ss:$16 sps:$4 sm:$0xff]  }
  0x21   :  { %v3703_v32 = vld [vmem:[%s5464_s3 + $0x2ec] ss:$16 sps:$4 sm:$0xff]   ;;  %v3698_v33 = vld [vmem:[%s5464_s3 + $0x2e0] ss:$16 sps:$4 sm:$0xff]  }
  0x22   :  { %v3727_v48 = vld [vmem:[%s5464_s3 + $0x36c] ss:$16 sps:$4 sm:$0xff]  }
  0x23   :  { %866 = vmatpush1.bf16.msra.mxu0 %v3609_v34  ;;  %952 = vmatpush1.bf16.msra.mxu1 %v3610_v35  ;;  %v3701_v34 = vld [vmem:[%s5464_s3 + $0x2e8] ss:$16 sps:$4 sm:$0xff]   ;;  %v3706_v35 = vld [vmem:[%s5464_s3 + $0x304] ss:$16 sps:$4 sm:$0xff]  }
  0x24   :  { %867 = vmatprep.subr.bf16.mxu0 %v3611_v36  ;;  %953 = vmatprep.subr.bf16.mxu1 %v3613_v37  ;;  %v3709_v36 = vld [vmem:[%s5464_s3 + $0x30c] ss:$16 sps:$4 sm:$0xff]   ;;  %v3704_v37 = vld [vmem:[%s5464_s3 + $0x300] ss:$16 sps:$4 sm:$0xff]  }
  0x27   :  { %868 = vmatpush1.bf16.msra.mxu0 %v3615_v38  ;;  %954 = vmatpush1.bf16.msra.mxu1 %v3616_v39  ;;  %v3707_v38 = vld [vmem:[%s5464_s3 + $0x308] ss:$16 sps:$4 sm:$0xff]   ;;  %v3712_v39 = vld [vmem:[%s5464_s3 + $0x324] ss:$16 sps:$4 sm:$0xff]  }
  0x28   :  { %869 = vmatprep.subr.bf16.mxu0 %v3617_v40  ;;  %955 = vmatprep.subr.bf16.mxu1 %v3619_v41  ;;  %v3715_v40 = vld [vmem:[%s5464_s3 + $0x32c] ss:$16 sps:$4 sm:$0xff]   ;;  %v3710_v41 = vld [vmem:[%s5464_s3 + $0x320] ss:$16 sps:$4 sm:$0xff]  }
  0x2b   :  { %870 = vmatpush1.bf16.msra.mxu0 %v3621_v42  ;;  %956 = vmatpush1.bf16.msra.mxu1 %v3622_v43  ;;  %v3713_v42 = vld [vmem:[%s5464_s3 + $0x328] ss:$16 sps:$4 sm:$0xff]   ;;  %v3718_v43 = vld [vmem:[%s5464_s3 + $0x344] ss:$16 sps:$4 sm:$0xff]  }
  0x2c   :  { %871 = vmatprep.subr.bf16.mxu0 %v3623_v44  ;;  %957 = vmatprep.subr.bf16.mxu1 %v3625_v45  ;;  %v3721_v44 = vld [vmem:[%s5464_s3 + $0x34c] ss:$16 sps:$4 sm:$0xff]   ;;  %v3716_v45 = vld [vmem:[%s5464_s3 + $0x340] ss:$16 sps:$4 sm:$0xff]  }
  0x2f   :  { %872 = vmatpush1.bf16.msra.mxu0 %v3627_v46  ;;  %958 = vmatpush1.bf16.msra.mxu1 %v3628_v47  ;;  %v3719_v46 = vld [vmem:[%s5464_s3 + $0x348] ss:$16 sps:$4 sm:$0xff]   ;;  %v3724_v47 = vld [vmem:[%s5464_s3 + $0x364] ss:$16 sps:$4 sm:$0xff]  }
  0x30   :  { %873 = vmatprep.subr.bf16.mxu0 %v3629_v49  ;;  %959 = vmatprep.subr.bf16.mxu1 %v3631_v50  ;;  %v3722_v49 = vld [vmem:[%s5464_s3 + $0x360] ss:$16 sps:$4 sm:$0xff]   ;;  %v3725_v50 = vld [vmem:[%s5464_s3 + $0x368] ss:$16 sps:$4 sm:$0xff]  }
  0x33   :  { %874 = vmatpush1.bf16.msra.mxu0 %v3633_v51  ;;  %960 = vmatpush1.bf16.msra.mxu1 %v3634_v52  ;;  %v3730_v51 = vld [vmem:[%s5464_s3 + $0x384] ss:$16 sps:$4 sm:$0xff]   ;;  %v3733_v52 = vld [vmem:[%s5464_s3 + $0x38c] ss:$16 sps:$4 sm:$0xff]  }
  0x34   :  { %875 = vmatprep.subr.bf16.mxu0 %v3635_v53  ;;  %961 = vmatprep.subr.bf16.mxu1 %v3637_v54  ;;  %v3728_v53 = vld [vmem:[%s5464_s3 + $0x380] ss:$16 sps:$4 sm:$0xff]   ;;  %v3731_v54 = vld [vmem:[%s5464_s3 + $0x388] ss:$16 sps:$4 sm:$0xff]  }
  0x37   :  { %876 = vmatpush1.bf16.msra.mxu0 %v3639_v55  ;;  %962 = vmatpush1.bf16.msra.mxu1 %v3640_v56  ;;  %v3736_v55 = vld [vmem:[%s5464_s3 + $0x3a4] ss:$16 sps:$4 sm:$0xff]   ;;  %v3739_v56 = vld [vmem:[%s5464_s3 + $0x3ac] ss:$16 sps:$4 sm:$0xff]  }
  0x38   :  { %877 = vmatprep.subr.bf16.mxu0 %v3641_v57  ;;  %963 = vmatprep.subr.bf16.mxu1 %v3643_v58  ;;  %v3734_v57 = vld [vmem:[%s5464_s3 + $0x3a0] ss:$16 sps:$4 sm:$0xff]   ;;  %v3737_v58 = vld [vmem:[%s5464_s3 + $0x3a8] ss:$16 sps:$4 sm:$0xff]  }
  0x3b   :  { %878 = vmatpush1.bf16.msra.mxu0 %v3645_v59  ;;  %964 = vmatpush1.bf16.msra.mxu1 %v3646_v60  ;;  %v3742_v59 = vld [vmem:[%s5464_s3 + $0x3c4] ss:$16 sps:$4 sm:$0xff]   ;;  %v3745_v60 = vld [vmem:[%s5464_s3 + $0x3cc] ss:$16 sps:$4 sm:$0xff]  }
  0x3c   :  { %879 = vmatprep.subr.bf16.mxu0 %v3647_v61  ;;  %965 = vmatprep.subr.bf16.mxu1 %v3649_v62  ;;  %v3740_v61 = vld [vmem:[%s5464_s3 + $0x3c0] ss:$16 sps:$4 sm:$0xff]   ;;  %v3743_v62 = vld [vmem:[%s5464_s3 + $0x3c8] ss:$16 sps:$4 sm:$0xff]  }
  0x3f   :  { %880 = vmatpush1.bf16.msra.mxu0 %v3651_v63  ;;  %966 = vmatpush1.bf16.msra.mxu1 %v3652_v0  ;;  %v3748_v63 = vld [vmem:[%s5464_s3 + $0x3e4] ss:$16 sps:$4 sm:$0xff]   ;;  %v3751_v0 = vld [vmem:[%s5464_s3 + $0x3ec] ss:$16 sps:$4 sm:$0xff]  }
  0x40   :  { %892 = vmatprep.subr.bf16.mxu0 %v3658_v1  ;;  %978 = vmatprep.subr.bf16.mxu1 %v3661_v2  ;;  %v3746_v1 = vld [vmem:[%s5464_s3 + $0x3e0] ss:$16 sps:$4 sm:$0xff]   ;;  %v3749_v2 = vld [vmem:[%s5464_s3 + $0x3e8] ss:$16 sps:$4 sm:$0xff]  }
  0x42   :  { %882 = vmatmul.mubr.bf16.vlgmr.msra.gmra.mrb[0].mxu0 %v3653_v3  ;;  %968 = vmatmul.mubr.bf16.vlgmr.msra.gmra.mrb[0].mxu1 %v3653_v3  ;;  %v3757_v3 = vld [vmem:[%s5466_s4 + $0x4] ss:$16 sps:$4 sm:$0xff]  }
  0x43   :  { %893 = vmatpush1.bf16.msra.mxu0 %v3656_v4  ;;  %979 = vmatpush1.bf16.msra.mxu1 %v3659_v5  ;;  %v3760_v4 = vld [vmem:[%s5466_s4 + $0xc] ss:$16 sps:$4 sm:$0xff]   ;;  %v3752_v5 = vld [vmem:[%s5465_s0 + $0x8] ss:$16 sps:$4 sm:$0xff]  }
  0x44   :  { %894 = vmatprep.subr.bf16.mxu0 %v3664_v6  ;;  %980 = vmatprep.subr.bf16.mxu1 %v3667_v7  ;;  %v3755_v6 = vld [vmem:[%s5466_s4] ss:$16 sps:$4 sm:$0xff]   ;;  %v3758_v7 = vld [vmem:[%s5466_s4 + $0x8] ss:$16 sps:$4 sm:$0xff]  }
  0x45   :  { %924 = vmatprep.mubr.bf16.mxu0 %v3754_v30  ;;  %1010 = vmatprep.mubr.bf16.mxu1 %v3754_v30  ;;  %v3796_v30 = vld [vmem:[%s5466_s4 + $0xcc] ss:$16 sps:$4 sm:$0xff]  }
  0x47   :  { %895 = vmatpush1.bf16.msra.mxu0 %v3662_v8  ;;  %981 = vmatpush1.bf16.msra.mxu1 %v3665_v9  ;;  %v3763_v8 = vld [vmem:[%s5466_s4 + $0x24] ss:$16 sps:$4 sm:$0xff]   ;;  %v3766_v9 = vld [vmem:[%s5466_s4 + $0x2c] ss:$16 sps:$4 sm:$0xff]  }
  0x48   :  { %896 = vmatprep.subr.bf16.mxu0 %v3670_v10  ;;  %982 = vmatprep.subr.bf16.mxu1 %v3673_v11  ;;  %v3761_v10 = vld [vmem:[%s5466_s4 + $0x20] ss:$16 sps:$4 sm:$0xff]   ;;  %v3764_v11 = vld [vmem:[%s5466_s4 + $0x28] ss:$16 sps:$4 sm:$0xff]  }
  0x4b   :  { %897 = vmatpush1.bf16.msra.mxu0 %v3668_v12  ;;  %983 = vmatpush1.bf16.msra.mxu1 %v3671_v13  ;;  %v3853_v12 = vld [vmem:[%s5467_s1 + $0x4] ss:$16 sps:$4 sm:$0xff]  }
  0x4c   :  { %898 = vmatprep.subr.bf16.mxu0 %v3676_v14  ;;  %984 = vmatprep.subr.bf16.mxu1 %v3679_v15  ;;  %v3769_v13 = vld [vmem:[%s5466_s4 + $0x44] ss:$16 sps:$4 sm:$0xff]   ;;  %v3772_v14 = vld [vmem:[%s5466_s4 + $0x4c] ss:$16 sps:$4 sm:$0xff]   ;;  %v3767_v15 = vld [vmem:[%s5466_s4 + $0x40] ss:$16 sps:$4 sm:$0xff]  }
  0x4f   :  { %899 = vmatpush1.bf16.msra.mxu0 %v3674_v16  ;;  %985 = vmatpush1.bf16.msra.mxu1 %v3677_v17  ;;  %v3770_v16 = vld [vmem:[%s5466_s4 + $0x48] ss:$16 sps:$4 sm:$0xff]   ;;  %v3775_v17 = vld [vmem:[%s5466_s4 + $0x64] ss:$16 sps:$4 sm:$0xff]  }
  0x50   :  { %900 = vmatprep.subr.bf16.mxu0 %v3682_v18  ;;  %986 = vmatprep.subr.bf16.mxu1 %v3685_v19  ;;  %v3778_v18 = vld [vmem:[%s5466_s4 + $0x6c] ss:$16 sps:$4 sm:$0xff]   ;;  %v3773_v19 = vld [vmem:[%s5466_s4 + $0x60] ss:$16 sps:$4 sm:$0xff]  }
  0x53   :  { %901 = vmatpush1.bf16.msra.mxu0 %v3680_v20  ;;  %987 = vmatpush1.bf16.msra.mxu1 %v3683_v21  ;;  %v3776_v20 = vld [vmem:[%s5466_s4 + $0x68] ss:$16 sps:$4 sm:$0xff]   ;;  %v3781_v21 = vld [vmem:[%s5466_s4 + $0x84] ss:$16 sps:$4 sm:$0xff]  }
  0x54   :  { %902 = vmatprep.subr.bf16.mxu0 %v3688_v22  ;;  %988 = vmatprep.subr.bf16.mxu1 %v3691_v23  ;;  %v3784_v22 = vld [vmem:[%s5466_s4 + $0x8c] ss:$16 sps:$4 sm:$0xff]   ;;  %v3779_v23 = vld [vmem:[%s5466_s4 + $0x80] ss:$16 sps:$4 sm:$0xff]  }
  0x57   :  { %903 = vmatpush1.bf16.msra.mxu0 %v3686_v24  ;;  %989 = vmatpush1.bf16.msra.mxu1 %v3689_v25  ;;  %v3782_v24 = vld [vmem:[%s5466_s4 + $0x88] ss:$16 sps:$4 sm:$0xff]   ;;  %v3787_v25 = vld [vmem:[%s5466_s4 + $0xa4] ss:$16 sps:$4 sm:$0xff]  }
  0x58   :  { %904 = vmatprep.subr.bf16.mxu0 %v3694_v26  ;;  %990 = vmatprep.subr.bf16.mxu1 %v3697_v27  ;;  %v3790_v26 = vld [vmem:[%s5466_s4 + $0xac] ss:$16 sps:$4 sm:$0xff]   ;;  %v3785_v27 = vld [vmem:[%s5466_s4 + $0xa0] ss:$16 sps:$4 sm:$0xff]  }
  0x5b   :  { %905 = vmatpush1.bf16.msra.mxu0 %v3692_v28  ;;  %991 = vmatpush1.bf16.msra.mxu1 %v3695_v29  ;;  %v3788_v28 = vld [vmem:[%s5466_s4 + $0xa8] ss:$16 sps:$4 sm:$0xff]   ;;  %v3793_v29 = vld [vmem:[%s5466_s4 + $0xc4] ss:$16 sps:$4 sm:$0xff]  }
  0x5c   :  { %906 = vmatprep.subr.bf16.mxu0 %v3700_v31  ;;  %992 = vmatprep.subr.bf16.mxu1 %v3703_v32  ;;  %v3791_v31 = vld [vmem:[%s5466_s4 + $0xc0] ss:$16 sps:$4 sm:$0xff]   ;;  %v3794_v32 = vld [vmem:[%s5466_s4 + $0xc8] ss:$16 sps:$4 sm:$0xff]  }
  0x5f   :  { %907 = vmatpush1.bf16.msra.mxu0 %v3698_v33  ;;  %993 = vmatpush1.bf16.msra.mxu1 %v3701_v34  ;;  %v3799_v33 = vld [vmem:[%s5466_s4 + $0xe4] ss:$16 sps:$4 sm:$0xff]   ;;  %v3802_v34 = vld [vmem:[%s5466_s4 + $0xec] ss:$16 sps:$4 sm:$0xff]  }
  0x60   :  { %908 = vmatprep.subr.bf16.mxu0 %v3706_v35  ;;  %994 = vmatprep.subr.bf16.mxu1 %v3709_v36  ;;  %v3797_v35 = vld [vmem:[%s5466_s4 + $0xe0] ss:$16 sps:$4 sm:$0xff]   ;;  %v3800_v36 = vld [vmem:[%s5466_s4 + $0xe8] ss:$16 sps:$4 sm:$0xff]  }
  0x63   :  { %909 = vmatpush1.bf16.msra.mxu0 %v3704_v37  ;;  %995 = vmatpush1.bf16.msra.mxu1 %v3707_v38  ;;  %v3805_v37 = vld [vmem:[%s5466_s4 + $0x104] ss:$16 sps:$4 sm:$0xff]   ;;  %v3808_v38 = vld [vmem:[%s5466_s4 + $0x10c] ss:$16 sps:$4 sm:$0xff]  }
  0x64   :  { %910 = vmatprep.subr.bf16.mxu0 %v3712_v39  ;;  %996 = vmatprep.subr.bf16.mxu1 %v3715_v40  ;;  %v3803_v39 = vld [vmem:[%s5466_s4 + $0x100] ss:$16 sps:$4 sm:$0xff]   ;;  %v3806_v40 = vld [vmem:[%s5466_s4 + $0x108] ss:$16 sps:$4 sm:$0xff]  }
  0x67   :  { %911 = vmatpush1.bf16.msra.mxu0 %v3710_v41  ;;  %997 = vmatpush1.bf16.msra.mxu1 %v3713_v42  ;;  %v3811_v41 = vld [vmem:[%s5466_s4 + $0x124] ss:$16 sps:$4 sm:$0xff]   ;;  %v3814_v42 = vld [vmem:[%s5466_s4 + $0x12c] ss:$16 sps:$4 sm:$0xff]  }
  0x68   :  { %912 = vmatprep.subr.bf16.mxu0 %v3718_v43  ;;  %998 = vmatprep.subr.bf16.mxu1 %v3721_v44  ;;  %v3809_v43 = vld [vmem:[%s5466_s4 + $0x120] ss:$16 sps:$4 sm:$0xff]   ;;  %v3812_v44 = vld [vmem:[%s5466_s4 + $0x128] ss:$16 sps:$4 sm:$0xff]  }
  0x6b   :  { %913 = vmatpush1.bf16.msra.mxu0 %v3716_v45  ;;  %999 = vmatpush1.bf16.msra.mxu1 %v3719_v46  ;;  %v3817_v45 = vld [vmem:[%s5466_s4 + $0x144] ss:$16 sps:$4 sm:$0xff]   ;;  %v3820_v46 = vld [vmem:[%s5466_s4 + $0x14c] ss:$16 sps:$4 sm:$0xff]  }
  0x6c   :  { %914 = vmatprep.subr.bf16.mxu0 %v3724_v47  ;;  %1000 = vmatprep.subr.bf16.mxu1 %v3727_v48  ;;  %v3815_v47 = vld [vmem:[%s5466_s4 + $0x140] ss:$16 sps:$4 sm:$0xff]   ;;  %v3818_v48 = vld [vmem:[%s5466_s4 + $0x148] ss:$16 sps:$4 sm:$0xff]  }
  0x6f   :  { %915 = vmatpush1.bf16.msra.mxu0 %v3722_v49  ;;  %1001 = vmatpush1.bf16.msra.mxu1 %v3725_v50  ;;  %v3823_v49 = vld [vmem:[%s5466_s4 + $0x164] ss:$16 sps:$4 sm:$0xff]   ;;  %v3826_v50 = vld [vmem:[%s5466_s4 + $0x16c] ss:$16 sps:$4 sm:$0xff]  }
  0x70   :  { %916 = vmatprep.subr.bf16.mxu0 %v3730_v51  ;;  %1002 = vmatprep.subr.bf16.mxu1 %v3733_v52  ;;  %v3821_v51 = vld [vmem:[%s5466_s4 + $0x160] ss:$16 sps:$4 sm:$0xff]   ;;  %v3824_v52 = vld [vmem:[%s5466_s4 + $0x168] ss:$16 sps:$4 sm:$0xff]  }
  0x73   :  { %917 = vmatpush1.bf16.msra.mxu0 %v3728_v53  ;;  %1003 = vmatpush1.bf16.msra.mxu1 %v3731_v54  ;;  %v3829_v53 = vld [vmem:[%s5466_s4 + $0x184] ss:$16 sps:$4 sm:$0xff]   ;;  %v3832_v54 = vld [vmem:[%s5466_s4 + $0x18c] ss:$16 sps:$4 sm:$0xff]  }
  0x74   :  { %918 = vmatprep.subr.bf16.mxu0 %v3736_v55  ;;  %1004 = vmatprep.subr.bf16.mxu1 %v3739_v56  ;;  %v3827_v55 = vld [vmem:[%s5466_s4 + $0x180] ss:$16 sps:$4 sm:$0xff]   ;;  %v3830_v56 = vld [vmem:[%s5466_s4 + $0x188] ss:$16 sps:$4 sm:$0xff]  }
  0x77   :  { %919 = vmatpush1.bf16.msra.mxu0 %v3734_v57  ;;  %1005 = vmatpush1.bf16.msra.mxu1 %v3737_v58  ;;  %v3835_v57 = vld [vmem:[%s5466_s4 + $0x1a4] ss:$16 sps:$4 sm:$0xff]   ;;  %v3838_v58 = vld [vmem:[%s5466_s4 + $0x1ac] ss:$16 sps:$4 sm:$0xff]  }
  0x78   :  { %920 = vmatprep.subr.bf16.mxu0 %v3742_v59  ;;  %1006 = vmatprep.subr.bf16.mxu1 %v3745_v60  ;;  %v3833_v59 = vld [vmem:[%s5466_s4 + $0x1a0] ss:$16 sps:$4 sm:$0xff]   ;;  %v3836_v60 = vld [vmem:[%s5466_s4 + $0x1a8] ss:$16 sps:$4 sm:$0xff]  }
  0x7b   :  { %921 = vmatpush1.bf16.msra.mxu0 %v3740_v61  ;;  %1007 = vmatpush1.bf16.msra.mxu1 %v3743_v62  ;;  %v3841_v61 = vld [vmem:[%s5466_s4 + $0x1c4] ss:$16 sps:$4 sm:$0xff]   ;;  %v3844_v62 = vld [vmem:[%s5466_s4 + $0x1cc] ss:$16 sps:$4 sm:$0xff]  }
  0x7c   :  { %922 = vmatprep.subr.bf16.mxu0 %v3748_v63  ;;  %1008 = vmatprep.subr.bf16.mxu1 %v3751_v0  ;;  %v3839_v63 = vld [vmem:[%s5466_s4 + $0x1c0] ss:$16 sps:$4 sm:$0xff]   ;;  %v3842_v0 = vld [vmem:[%s5466_s4 + $0x1c8] ss:$16 sps:$4 sm:$0xff]  }
  0x7f   :  { %923 = vmatpush1.bf16.msra.mxu0 %v3746_v1  ;;  %1009 = vmatpush1.bf16.msra.mxu1 %v3749_v2  ;;  %v3847_v1 = vld [vmem:[%s5466_s4 + $0x1e4] ss:$16 sps:$4 sm:$0xff]   ;;  %v3850_v2 = vld [vmem:[%s5466_s4 + $0x1ec] ss:$16 sps:$4 sm:$0xff]  }
  0x80   :  { %1863 = vmatprep.subr.bf16.mxu0 %v3757_v3  ;;  %1949 = vmatprep.subr.bf16.mxu1 %v3760_v4  ;;  %v3845_v3 = vld [vmem:[%s5466_s4 + $0x1e0] ss:$16 sps:$4 sm:$0xff]   ;;  %v3848_v4 = vld [vmem:[%s5466_s4 + $0x1e8] ss:$16 sps:$4 sm:$0xff]  }
  0x82   :  { %925 = vmatmul.mubr.bf16.vlgmr.msra.gmra.mrb[0].mxu0 %v3752_v5  ;;  %1011 = vmatmul.mubr.bf16.vlgmr.msra.gmra.mrb[0].mxu1 %v3752_v5  ;;  %v3856_v5 = vld [vmem:[%s5466_s4 + $0x204] ss:$16 sps:$4 sm:$0xff]  }
  0x83   :  { %1864 = vmatpush1.bf16.msra.mxu0 %v3755_v6  ;;  %1950 = vmatpush1.bf16.msra.mxu1 %v3758_v7  ;;  %v3859_v6 = vld [vmem:[%s5466_s4 + $0x20c] ss:$16 sps:$4 sm:$0xff]   ;;  %v3851_v7 = vld [vmem:[%s5467_s1] ss:$16 sps:$4 sm:$0xff]  }
  0x84   :  { %1865 = vmatprep.subr.bf16.mxu0 %v3763_v8  ;;  %1951 = vmatprep.subr.bf16.mxu1 %v3766_v9  ;;  %v3854_v8 = vld [vmem:[%s5466_s4 + $0x200] ss:$16 sps:$4 sm:$0xff]   ;;  %v3857_v9 = vld [vmem:[%s5466_s4 + $0x208] ss:$16 sps:$4 sm:$0xff]  }
  0x85   :  { %1895 = vmatprep.mubr.bf16.mxu0 %v3853_v12  ;;  %1981 = vmatprep.mubr.bf16.mxu1 %v3853_v12  ;;  %v3952_v12 = vld [vmem:[%s5467_s1 + $0xc] ss:$16 sps:$4 sm:$0xff]  }
  0x87   :  { %1866 = vmatpush1.bf16.msra.mxu0 %v3761_v10  ;;  %1952 = vmatpush1.bf16.msra.mxu1 %v3764_v11  ;;  %v3862_v10 = vld [vmem:[%s5466_s4 + $0x224] ss:$16 sps:$4 sm:$0xff]   ;;  %v3865_v11 = vld [vmem:[%s5466_s4 + $0x22c] ss:$16 sps:$4 sm:$0xff]  }
  0x88   :  { %1867 = vmatprep.subr.bf16.mxu0 %v3769_v13  ;;  %1953 = vmatprep.subr.bf16.mxu1 %v3772_v14  ;;  %v3860_v13 = vld [vmem:[%s5466_s4 + $0x220] ss:$16 sps:$4 sm:$0xff]   ;;  %v3863_v14 = vld [vmem:[%s5466_s4 + $0x228] ss:$16 sps:$4 sm:$0xff]  }
  0x8b   :  { %1868 = vmatpush1.bf16.msra.mxu0 %v3767_v15  ;;  %1954 = vmatpush1.bf16.msra.mxu1 %v3770_v16  ;;  %v3868_v15 = vld [vmem:[%s5466_s4 + $0x244] ss:$16 sps:$4 sm:$0xff]   ;;  %v3871_v16 = vld [vmem:[%s5466_s4 + $0x24c] ss:$16 sps:$4 sm:$0xff]  }
  0x8c   :  { %1869 = vmatprep.subr.bf16.mxu0 %v3775_v17  ;;  %1955 = vmatprep.subr.bf16.mxu1 %v3778_v18  ;;  %v3866_v17 = vld [vmem:[%s5466_s4 + $0x240] ss:$16 sps:$4 sm:$0xff]   ;;  %v3869_v18 = vld [vmem:[%s5466_s4 + $0x248] ss:$16 sps:$4 sm:$0xff]  }
  0x8f   :  { %1870 = vmatpush1.bf16.msra.mxu0 %v3773_v19  ;;  %1956 = vmatpush1.bf16.msra.mxu1 %v3776_v20  ;;  %v3874_v19 = vld [vmem:[%s5466_s4 + $0x264] ss:$16 sps:$4 sm:$0xff]   ;;  %v3877_v20 = vld [vmem:[%s5466_s4 + $0x26c] ss:$16 sps:$4 sm:$0xff]  }
  0x90   :  { %1871 = vmatprep.subr.bf16.mxu0 %v3781_v21  ;;  %1957 = vmatprep.subr.bf16.mxu1 %v3784_v22  ;;  %v3872_v21 = vld [vmem:[%s5466_s4 + $0x260] ss:$16 sps:$4 sm:$0xff]   ;;  %v3875_v22 = vld [vmem:[%s5466_s4 + $0x268] ss:$16 sps:$4 sm:$0xff]  }
  0x93   :  { %1872 = vmatpush1.bf16.msra.mxu0 %v3779_v23  ;;  %1958 = vmatpush1.bf16.msra.mxu1 %v3782_v24  ;;  %v3880_v23 = vld [vmem:[%s5466_s4 + $0x284] ss:$16 sps:$4 sm:$0xff]   ;;  %v3883_v24 = vld [vmem:[%s5466_s4 + $0x28c] ss:$16 sps:$4 sm:$0xff]  }
  0x94   :  { %1873 = vmatprep.subr.bf16.mxu0 %v3787_v25  ;;  %1959 = vmatprep.subr.bf16.mxu1 %v3790_v26  ;;  %v3878_v25 = vld [vmem:[%s5466_s4 + $0x280] ss:$16 sps:$4 sm:$0xff]   ;;  %v3881_v26 = vld [vmem:[%s5466_s4 + $0x288] ss:$16 sps:$4 sm:$0xff]  }
  0x97   :  { %1874 = vmatpush1.bf16.msra.mxu0 %v3785_v27  ;;  %1960 = vmatpush1.bf16.msra.mxu1 %v3788_v28  ;;  %v3886_v27 = vld [vmem:[%s5466_s4 + $0x2a4] ss:$16 sps:$4 sm:$0xff]   ;;  %v3889_v28 = vld [vmem:[%s5466_s4 + $0x2ac] ss:$16 sps:$4 sm:$0xff]  }
  0x98   :  { %1875 = vmatprep.subr.bf16.mxu0 %v3793_v29  ;;  %1961 = vmatprep.subr.bf16.mxu1 %v3796_v30  ;;  %v3884_v29 = vld [vmem:[%s5466_s4 + $0x2a0] ss:$16 sps:$4 sm:$0xff]   ;;  %v3887_v30 = vld [vmem:[%s5466_s4 + $0x2a8] ss:$16 sps:$4 sm:$0xff]  }
  0x9b   :  { %1876 = vmatpush1.bf16.msra.mxu0 %v3791_v31  ;;  %1962 = vmatpush1.bf16.msra.mxu1 %v3794_v32  ;;  %v3892_v31 = vld [vmem:[%s5466_s4 + $0x2c4] ss:$16 sps:$4 sm:$0xff]   ;;  %v3895_v32 = vld [vmem:[%s5466_s4 + $0x2cc] ss:$16 sps:$4 sm:$0xff]  }
  0x9c   :  { %1877 = vmatprep.subr.bf16.mxu0 %v3799_v33  ;;  %1963 = vmatprep.subr.bf16.mxu1 %v3802_v34  ;;  %v3890_v33 = vld [vmem:[%s5466_s4 + $0x2c0] ss:$16 sps:$4 sm:$0xff]   ;;  %v3893_v34 = vld [vmem:[%s5466_s4 + $0x2c8] ss:$16 sps:$4 sm:$0xff]  }
  0x9f   :  { %1878 = vmatpush1.bf16.msra.mxu0 %v3797_v35  ;;  %1964 = vmatpush1.bf16.msra.mxu1 %v3800_v36  ;;  %v3898_v35 = vld [vmem:[%s5466_s4 + $0x2e4] ss:$16 sps:$4 sm:$0xff]   ;;  %v3901_v36 = vld [vmem:[%s5466_s4 + $0x2ec] ss:$16 sps:$4 sm:$0xff]  }
  0xa0   :  { %1879 = vmatprep.subr.bf16.mxu0 %v3805_v37  ;;  %1965 = vmatprep.subr.bf16.mxu1 %v3808_v38  ;;  %v3896_v37 = vld [vmem:[%s5466_s4 + $0x2e0] ss:$16 sps:$4 sm:$0xff]   ;;  %v3899_v38 = vld [vmem:[%s5466_s4 + $0x2e8] ss:$16 sps:$4 sm:$0xff]  }
  0xa3   :  { %1880 = vmatpush1.bf16.msra.mxu0 %v3803_v39  ;;  %1966 = vmatpush1.bf16.msra.mxu1 %v3806_v40  ;;  %v3904_v39 = vld [vmem:[%s5466_s4 + $0x304] ss:$16 sps:$4 sm:$0xff]   ;;  %v3907_v40 = vld [vmem:[%s5466_s4 + $0x30c] ss:$16 sps:$4 sm:$0xff]  }
  0xa4   :  { %1881 = vmatprep.subr.bf16.mxu0 %v3811_v41  ;;  %1967 = vmatprep.subr.bf16.mxu1 %v3814_v42  ;;  %v3902_v41 = vld [vmem:[%s5466_s4 + $0x300] ss:$16 sps:$4 sm:$0xff]   ;;  %v3905_v42 = vld [vmem:[%s5466_s4 + $0x308] ss:$16 sps:$4 sm:$0xff]  }
  0xa7   :  { %1882 = vmatpush1.bf16.msra.mxu0 %v3809_v43  ;;  %1968 = vmatpush1.bf16.msra.mxu1 %v3812_v44  ;;  %v3910_v43 = vld [vmem:[%s5466_s4 + $0x324] ss:$16 sps:$4 sm:$0xff]   ;;  %v3913_v44 = vld [vmem:[%s5466_s4 + $0x32c] ss:$16 sps:$4 sm:$0xff]  }
  0xa8   :  { %1883 = vmatprep.subr.bf16.mxu0 %v3817_v45  ;;  %1969 = vmatprep.subr.bf16.mxu1 %v3820_v46  ;;  %v3908_v45 = vld [vmem:[%s5466_s4 + $0x320] ss:$16 sps:$4 sm:$0xff]   ;;  %v3911_v46 = vld [vmem:[%s5466_s4 + $0x328] ss:$16 sps:$4 sm:$0xff]  }
  0xab   :  { %1884 = vmatpush1.bf16.msra.mxu0 %v3815_v47  ;;  %1970 = vmatpush1.bf16.msra.mxu1 %v3818_v48  ;;  %v3916_v47 = vld [vmem:[%s5466_s4 + $0x344] ss:$16 sps:$4 sm:$0xff]   ;;  %v3919_v48 = vld [vmem:[%s5466_s4 + $0x34c] ss:$16 sps:$4 sm:$0xff]  }
  0xac   :  { %1885 = vmatprep.subr.bf16.mxu0 %v3823_v49  ;;  %1971 = vmatprep.subr.bf16.mxu1 %v3826_v50  ;;  %v3914_v49 = vld [vmem:[%s5466_s4 + $0x340] ss:$16 sps:$4 sm:$0xff]   ;;  %v3917_v50 = vld [vmem:[%s5466_s4 + $0x348] ss:$16 sps:$4 sm:$0xff]  }
  0xaf   :  { %1886 = vmatpush1.bf16.msra.mxu0 %v3821_v51  ;;  %1972 = vmatpush1.bf16.msra.mxu1 %v3824_v52  ;;  %v3922_v51 = vld [vmem:[%s5466_s4 + $0x364] ss:$16 sps:$4 sm:$0xff]   ;;  %v3925_v52 = vld [vmem:[%s5466_s4 + $0x36c] ss:$16 sps:$4 sm:$0xff]  }
  0xb0   :  { %1887 = vmatprep.subr.bf16.mxu0 %v3829_v53  ;;  %1973 = vmatprep.subr.bf16.mxu1 %v3832_v54  ;;  %v3920_v53 = vld [vmem:[%s5466_s4 + $0x360] ss:$16 sps:$4 sm:$0xff]   ;;  %v3923_v54 = vld [vmem:[%s5466_s4 + $0x368] ss:$16 sps:$4 sm:$0xff]  }
  0xb3   :  { %1888 = vmatpush1.bf16.msra.mxu0 %v3827_v55  ;;  %1974 = vmatpush1.bf16.msra.mxu1 %v3830_v56  ;;  %v3928_v55 = vld [vmem:[%s5466_s4 + $0x384] ss:$16 sps:$4 sm:$0xff]   ;;  %v3931_v56 = vld [vmem:[%s5466_s4 + $0x38c] ss:$16 sps:$4 sm:$0xff]  }
  0xb4   :  { %1889 = vmatprep.subr.bf16.mxu0 %v3835_v57  ;;  %1975 = vmatprep.subr.bf16.mxu1 %v3838_v58  ;;  %v3926_v57 = vld [vmem:[%s5466_s4 + $0x380] ss:$16 sps:$4 sm:$0xff]   ;;  %v3929_v58 = vld [vmem:[%s5466_s4 + $0x388] ss:$16 sps:$4 sm:$0xff]  }
  0xb7   :  { %1890 = vmatpush1.bf16.msra.mxu0 %v3833_v59  ;;  %1976 = vmatpush1.bf16.msra.mxu1 %v3836_v60  ;;  %v3934_v59 = vld [vmem:[%s5466_s4 + $0x3a4] ss:$16 sps:$4 sm:$0xff]   ;;  %v3937_v60 = vld [vmem:[%s5466_s4 + $0x3ac] ss:$16 sps:$4 sm:$0xff]  }
  0xb8   :  { %1891 = vmatprep.subr.bf16.mxu0 %v3841_v61  ;;  %1977 = vmatprep.subr.bf16.mxu1 %v3844_v62  ;;  %v3932_v61 = vld [vmem:[%s5466_s4 + $0x3a0] ss:$16 sps:$4 sm:$0xff]   ;;  %v3935_v62 = vld [vmem:[%s5466_s4 + $0x3a8] ss:$16 sps:$4 sm:$0xff]  }
  0xbb   :  { %1892 = vmatpush1.bf16.msra.mxu0 %v3839_v63  ;;  %1978 = vmatpush1.bf16.msra.mxu1 %v3842_v0  ;;  %v3940_v63 = vld [vmem:[%s5466_s4 + $0x3c4] ss:$16 sps:$4 sm:$0xff]   ;;  %v3943_v0 = vld [vmem:[%s5466_s4 + $0x3cc] ss:$16 sps:$4 sm:$0xff]  }
  0xbc   :  { %1893 = vmatprep.subr.bf16.mxu0 %v3847_v1  ;;  %1979 = vmatprep.subr.bf16.mxu1 %v3850_v2  ;;  %v3938_v1 = vld [vmem:[%s5466_s4 + $0x3c0] ss:$16 sps:$4 sm:$0xff]   ;;  %v3941_v2 = vld [vmem:[%s5466_s4 + $0x3c8] ss:$16 sps:$4 sm:$0xff]  }
  0xbf   :  { %1894 = vmatpush1.bf16.msra.mxu0 %v3845_v3  ;;  %1980 = vmatpush1.bf16.msra.mxu1 %v3848_v4  ;;  %v3946_v3 = vld [vmem:[%s5466_s4 + $0x3e4] ss:$16 sps:$4 sm:$0xff]   ;;  %v3949_v4 = vld [vmem:[%s5466_s4 + $0x3ec] ss:$16 sps:$4 sm:$0xff]  }
  0xc0   :  { %1906 = vmatprep.subr.bf16.mxu0 %v3856_v5  ;;  %1992 = vmatprep.subr.bf16.mxu1 %v3859_v6  ;;  %v3944_v5 = vld [vmem:[%s5466_s4 + $0x3e0] ss:$16 sps:$4 sm:$0xff]   ;;  %v3947_v6 = vld [vmem:[%s5466_s4 + $0x3e8] ss:$16 sps:$4 sm:$0xff]  }
  0xc2   :  { %1896 = vmatmul.mubr.bf16.vlgmr.msra.gmra.mrb[4].mxu0 %v3851_v7  ;;  %1982 = vmatmul.mubr.bf16.vlgmr.msra.gmra.mrb[4].mxu1 %v3851_v7  ;;  %v3955_v7 = vld [vmem:[%s5468_s5 + $0x4] ss:$16 sps:$4 sm:$0xff]  }
  0xc3   :  { %1907 = vmatpush1.bf16.msra.mxu0 %v3854_v8  ;;  %1993 = vmatpush1.bf16.msra.mxu1 %v3857_v9  ;;  %v3958_v8 = vld [vmem:[%s5468_s5 + $0xc] ss:$16 sps:$4 sm:$0xff]   ;;  %v3950_v9 = vld [vmem:[%s5467_s1 + $0x8] ss:$16 sps:$4 sm:$0xff]  }
  0xc4   :  { %1908 = vmatprep.subr.bf16.mxu0 %v3862_v10  ;;  %1994 = vmatprep.subr.bf16.mxu1 %v3865_v11  ;;  %v3953_v10 = vld [vmem:[%s5468_s5] ss:$16 sps:$4 sm:$0xff]   ;;  %v3956_v11 = vld [vmem:[%s5468_s5 + $0x8] ss:$16 sps:$4 sm:$0xff]  }
  0xc5   :  { %1938 = vmatprep.mubr.bf16.mxu0 %v3952_v12  ;;  %2024 = vmatprep.mubr.bf16.mxu1 %v3952_v12  ;;  %v3961_v12 = vld [vmem:[%s5468_s5 + $0x24] ss:$16 sps:$4 sm:$0xff]  }
  0xc7   :  { %1909 = vmatpush1.bf16.msra.mxu0 %v3860_v13  ;;  %1995 = vmatpush1.bf16.msra.mxu1 %v3863_v14  ;;  %v3964_v13 = vld [vmem:[%s5468_s5 + $0x2c] ss:$16 sps:$4 sm:$0xff]   ;;  %v4051_v14 = vld [vmem:[%s5469_s2 + $0x4] ss:$16 sps:$4 sm:$0xff]  }
  0xc8   :  { %1910 = vmatprep.subr.bf16.mxu0 %v3868_v15  ;;  %1996 = vmatprep.subr.bf16.mxu1 %v3871_v16  ;;  %v3959_v15 = vld [vmem:[%s5468_s5 + $0x20] ss:$16 sps:$4 sm:$0xff]   ;;  %v3962_v16 = vld [vmem:[%s5468_s5 + $0x28] ss:$16 sps:$4 sm:$0xff]  }
  0xcb   :  { %1911 = vmatpush1.bf16.msra.mxu0 %v3866_v17  ;;  %1997 = vmatpush1.bf16.msra.mxu1 %v3869_v18  ;;  %v3967_v17 = vld [vmem:[%s5468_s5 + $0x44] ss:$16 sps:$4 sm:$0xff]   ;;  %v3970_v18 = vld [vmem:[%s5468_s5 + $0x4c] ss:$16 sps:$4 sm:$0xff]  }
  0xcc   :  { %1912 = vmatprep.subr.bf16.mxu0 %v3874_v19  ;;  %1998 = vmatprep.subr.bf16.mxu1 %v3877_v20  ;;  %v3965_v19 = vld [vmem:[%s5468_s5 + $0x40] ss:$16 sps:$4 sm:$0xff]   ;;  %v3968_v20 = vld [vmem:[%s5468_s5 + $0x48] ss:$16 sps:$4 sm:$0xff]  }
  0xcf   :  { %1913 = vmatpush1.bf16.msra.mxu0 %v3872_v21  ;;  %1999 = vmatpush1.bf16.msra.mxu1 %v3875_v22  ;;  %v3973_v21 = vld [vmem:[%s5468_s5 + $0x64] ss:$16 sps:$4 sm:$0xff]   ;;  %v3976_v22 = vld [vmem:[%s5468_s5 + $0x6c] ss:$16 sps:$4 sm:$0xff]  }
  0xd0   :  { %1914 = vmatprep.subr.bf16.mxu0 %v3880_v23  ;;  %2000 = vmatprep.subr.bf16.mxu1 %v3883_v24  ;;  %v3971_v23 = vld [vmem:[%s5468_s5 + $0x60] ss:$16 sps:$4 sm:$0xff]   ;;  %v3974_v24 = vld [vmem:[%s5468_s5 + $0x68] ss:$16 sps:$4 sm:$0xff]  }
  0xd3   :  { %1915 = vmatpush1.bf16.msra.mxu0 %v3878_v25  ;;  %2001 = vmatpush1.bf16.msra.mxu1 %v3881_v26  ;;  %v3979_v25 = vld [vmem:[%s5468_s5 + $0x84] ss:$16 sps:$4 sm:$0xff]   ;;  %v3982_v26 = vld [vmem:[%s5468_s5 + $0x8c] ss:$16 sps:$4 sm:$0xff]  }
  0xd4   :  { %1916 = vmatprep.subr.bf16.mxu0 %v3886_v27  ;;  %2002 = vmatprep.subr.bf16.mxu1 %v3889_v28  ;;  %v3977_v27 = vld [vmem:[%s5468_s5 + $0x80] ss:$16 sps:$4 sm:$0xff]   ;;  %v3980_v28 = vld [vmem:[%s5468_s5 + $0x88] ss:$16 sps:$4 sm:$0xff]  }
  0xd7   :  { %1917 = vmatpush1.bf16.msra.mxu0 %v3884_v29  ;;  %2003 = vmatpush1.bf16.msra.mxu1 %v3887_v30  ;;  %v3985_v29 = vld [vmem:[%s5468_s5 + $0xa4] ss:$16 sps:$4 sm:$0xff]   ;;  %v3988_v30 = vld [vmem:[%s5468_s5 + $0xac] ss:$16 sps:$4 sm:$0xff]  }
  0xd8   :  { %1918 = vmatprep.subr.bf16.mxu0 %v3892_v31  ;;  %2004 = vmatprep.subr.bf16.mxu1 %v3895_v32  ;;  %v3983_v31 = vld [vmem:[%s5468_s5 + $0xa0] ss:$16 sps:$4 sm:$0xff]   ;;  %v3986_v32 = vld [vmem:[%s5468_s5 + $0xa8] ss:$16 sps:$4 sm:$0xff]  }
  0xdb   :  { %1919 = vmatpush1.bf16.msra.mxu0 %v3890_v33  ;;  %2005 = vmatpush1.bf16.msra.mxu1 %v3893_v34  ;;  %v3991_v33 = vld [vmem:[%s5468_s5 + $0xc4] ss:$16 sps:$4 sm:$0xff]   ;;  %v3994_v34 = vld [vmem:[%s5468_s5 + $0xcc] ss:$16 sps:$4 sm:$0xff]  }
  0xdc   :  { %1920 = vmatprep.subr.bf16.mxu0 %v3898_v35  ;;  %2006 = vmatprep.subr.bf16.mxu1 %v3901_v36  ;;  %v3989_v35 = vld [vmem:[%s5468_s5 + $0xc0] ss:$16 sps:$4 sm:$0xff]   ;;  %v3992_v36 = vld [vmem:[%s5468_s5 + $0xc8] ss:$16 sps:$4 sm:$0xff]  }
  0xdf   :  { %1921 = vmatpush1.bf16.msra.mxu0 %v3896_v37  ;;  %2007 = vmatpush1.bf16.msra.mxu1 %v3899_v38  ;;  %v3997_v37 = vld [vmem:[%s5468_s5 + $0xe4] ss:$16 sps:$4 sm:$0xff]   ;;  %v4000_v38 = vld [vmem:[%s5468_s5 + $0xec] ss:$16 sps:$4 sm:$0xff]  }
  0xe0   :  { %1922 = vmatprep.subr.bf16.mxu0 %v3904_v39  ;;  %2008 = vmatprep.subr.bf16.mxu1 %v3907_v40  ;;  %v3995_v39 = vld [vmem:[%s5468_s5 + $0xe0] ss:$16 sps:$4 sm:$0xff]   ;;  %v3998_v40 = vld [vmem:[%s5468_s5 + $0xe8] ss:$16 sps:$4 sm:$0xff]  }
  0xe3   :  { %1923 = vmatpush1.bf16.msra.mxu0 %v3902_v41  ;;  %2009 = vmatpush1.bf16.msra.mxu1 %v3905_v42  ;;  %v4003_v41 = vld [vmem:[%s5468_s5 + $0x104] ss:$16 sps:$4 sm:$0xff]   ;;  %v4006_v42 = vld [vmem:[%s5468_s5 + $0x10c] ss:$16 sps:$4 sm:$0xff]  }
  0xe4   :  { %1924 = vmatprep.subr.bf16.mxu0 %v3910_v43  ;;  %2010 = vmatprep.subr.bf16.mxu1 %v3913_v44  ;;  %v4001_v43 = vld [vmem:[%s5468_s5 + $0x100] ss:$16 sps:$4 sm:$0xff]   ;;  %v4004_v44 = vld [vmem:[%s5468_s5 + $0x108] ss:$16 sps:$4 sm:$0xff]  }
  0xe7   :  { %1925 = vmatpush1.bf16.msra.mxu0 %v3908_v45  ;;  %2011 = vmatpush1.bf16.msra.mxu1 %v3911_v46  ;;  %v4009_v45 = vld [vmem:[%s5468_s5 + $0x124] ss:$16 sps:$4 sm:$0xff]   ;;  %v4012_v46 = vld [vmem:[%s5468_s5 + $0x12c] ss:$16 sps:$4 sm:$0xff]  }
  0xe8   :  { %1926 = vmatprep.subr.bf16.mxu0 %v3916_v47  ;;  %2012 = vmatprep.subr.bf16.mxu1 %v3919_v48  ;;  %v4007_v47 = vld [vmem:[%s5468_s5 + $0x120] ss:$16 sps:$4 sm:$0xff]   ;;  %v4010_v48 = vld [vmem:[%s5468_s5 + $0x128] ss:$16 sps:$4 sm:$0xff]  }
  0xeb   :  { %1927 = vmatpush1.bf16.msra.mxu0 %v3914_v49  ;;  %2013 = vmatpush1.bf16.msra.mxu1 %v3917_v50  ;;  %v4015_v49 = vld [vmem:[%s5468_s5 + $0x144] ss:$16 sps:$4 sm:$0xff]   ;;  %v4018_v50 = vld [vmem:[%s5468_s5 + $0x14c] ss:$16 sps:$4 sm:$0xff]  }
  0xec   :  { %1928 = vmatprep.subr.bf16.mxu0 %v3922_v51  ;;  %2014 = vmatprep.subr.bf16.mxu1 %v3925_v52  ;;  %v4013_v51 = vld [vmem:[%s5468_s5 + $0x140] ss:$16 sps:$4 sm:$0xff]   ;;  %v4016_v52 = vld [vmem:[%s5468_s5 + $0x148] ss:$16 sps:$4 sm:$0xff]  }
  0xef   :  { %1929 = vmatpush1.bf16.msra.mxu0 %v3920_v53  ;;  %2015 = vmatpush1.bf16.msra.mxu1 %v3923_v54  ;;  %v4021_v53 = vld [vmem:[%s5468_s5 + $0x164] ss:$16 sps:$4 sm:$0xff]   ;;  %v4024_v54 = vld [vmem:[%s5468_s5 + $0x16c] ss:$16 sps:$4 sm:$0xff]  }
  0xf0   :  { %1930 = vmatprep.subr.bf16.mxu0 %v3928_v55  ;;  %2016 = vmatprep.subr.bf16.mxu1 %v3931_v56  ;;  %v4019_v55 = vld [vmem:[%s5468_s5 + $0x160] ss:$16 sps:$4 sm:$0xff]   ;;  %v4022_v56 = vld [vmem:[%s5468_s5 + $0x168] ss:$16 sps:$4 sm:$0xff]  }
  0xf3   :  { %1931 = vmatpush1.bf16.msra.mxu0 %v3926_v57  ;;  %2017 = vmatpush1.bf16.msra.mxu1 %v3929_v58  ;;  %v4027_v57 = vld [vmem:[%s5468_s5 + $0x184] ss:$16 sps:$4 sm:$0xff]   ;;  %v4030_v58 = vld [vmem:[%s5468_s5 + $0x18c] ss:$16 sps:$4 sm:$0xff]  }
  0xf4   :  { %1932 = vmatprep.subr.bf16.mxu0 %v3934_v59  ;;  %2018 = vmatprep.subr.bf16.mxu1 %v3937_v60  ;;  %v4025_v59 = vld [vmem:[%s5468_s5 + $0x180] ss:$16 sps:$4 sm:$0xff]   ;;  %v4028_v60 = vld [vmem:[%s5468_s5 + $0x188] ss:$16 sps:$4 sm:$0xff]  }
  0xf7   :  { %1933 = vmatpush1.bf16.msra.mxu0 %v3932_v61  ;;  %2019 = vmatpush1.bf16.msra.mxu1 %v3935_v62  ;;  %v4033_v61 = vld [vmem:[%s5468_s5 + $0x1a4] ss:$16 sps:$4 sm:$0xff]   ;;  %v4036_v62 = vld [vmem:[%s5468_s5 + $0x1ac] ss:$16 sps:$4 sm:$0xff]  }
  0xf8   :  { %1934 = vmatprep.subr.bf16.mxu0 %v3940_v63  ;;  %2020 = vmatprep.subr.bf16.mxu1 %v3943_v0  ;;  %v4031_v63 = vld [vmem:[%s5468_s5 + $0x1a0] ss:$16 sps:$4 sm:$0xff]   ;;  %v4034_v0 = vld [vmem:[%s5468_s5 + $0x1a8] ss:$16 sps:$4 sm:$0xff]  }
  0xfb   :  { %1935 = vmatpush1.bf16.msra.mxu0 %v3938_v1  ;;  %2021 = vmatpush1.bf16.msra.mxu1 %v3941_v2  ;;  %v4039_v1 = vld [vmem:[%s5468_s5 + $0x1c4] ss:$16 sps:$4 sm:$0xff]   ;;  %v4042_v2 = vld [vmem:[%s5468_s5 + $0x1cc] ss:$16 sps:$4 sm:$0xff]  }
  0xfc   :  { %1936 = vmatprep.subr.bf16.mxu0 %v3946_v3  ;;  %2022 = vmatprep.subr.bf16.mxu1 %v3949_v4  ;;  %v4037_v3 = vld [vmem:[%s5468_s5 + $0x1c0] ss:$16 sps:$4 sm:$0xff]   ;;  %v4040_v4 = vld [vmem:[%s5468_s5 + $0x1c8] ss:$16 sps:$4 sm:$0xff]  }
  0xff   :  { %1937 = vmatpush1.bf16.msra.mxu0 %v3944_v5  ;;  %2023 = vmatpush1.bf16.msra.mxu1 %v3947_v6  ;;  %v4045_v5 = vld [vmem:[%s5468_s5 + $0x1e4] ss:$16 sps:$4 sm:$0xff]   ;;  %v4048_v6 = vld [vmem:[%s5468_s5 + $0x1ec] ss:$16 sps:$4 sm:$0xff]  }
 0x100   :  { %2877 = vmatprep.subr.bf16.mxu0 %v3955_v7  ;;  %2963 = vmatprep.subr.bf16.mxu1 %v3958_v8  ;;  %v4043_v7 = vld [vmem:[%s5468_s5 + $0x1e0] ss:$16 sps:$4 sm:$0xff]   ;;  %v4046_v8 = vld [vmem:[%s5468_s5 + $0x1e8] ss:$16 sps:$4 sm:$0xff]  }
 0x102   :  { %1939 = vmatmul.mubr.bf16.vlgmr.msra.gmra.mrb[4].mxu0 %v3950_v9  ;;  %2025 = vmatmul.mubr.bf16.vlgmr.msra.gmra.mrb[4].mxu1 %v3950_v9  ;;  %v4054_v9 = vld [vmem:[%s5468_s5 + $0x204] ss:$16 sps:$4 sm:$0xff]  }
 0x103   :  { %2878 = vmatpush1.bf16.msra.mxu0 %v3953_v10  ;;  %2964 = vmatpush1.bf16.msra.mxu1 %v3956_v11  ;;  %v4057_v10 = vld [vmem:[%s5468_s5 + $0x20c] ss:$16 sps:$4 sm:$0xff]   ;;  %v4049_v11 = vld [vmem:[%s5469_s2] ss:$16 sps:$4 sm:$0xff]  }
 0x104   :  { %2879 = vmatprep.subr.bf16.mxu0 %v3961_v12  ;;  %2965 = vmatprep.subr.bf16.mxu1 %v3964_v13  ;;  %v4052_v12 = vld [vmem:[%s5468_s5 + $0x200] ss:$16 sps:$4 sm:$0xff]   ;;  %v4055_v13 = vld [vmem:[%s5468_s5 + $0x208] ss:$16 sps:$4 sm:$0xff]  }
 0x105   :  { %2909 = vmatprep.mubr.bf16.mxu0 %v4051_v14  ;;  %2995 = vmatprep.mubr.bf16.mxu1 %v4051_v14  ;;  %v4060_v14 = vld [vmem:[%s5468_s5 + $0x224] ss:$16 sps:$4 sm:$0xff]  }
 0x107   :  { %2880 = vmatpush1.bf16.msra.mxu0 %v3959_v15  ;;  %2966 = vmatpush1.bf16.msra.mxu1 %v3962_v16  ;;  %v4063_v15 = vld [vmem:[%s5468_s5 + $0x22c] ss:$16 sps:$4 sm:$0xff]  }
 0x108   :  { %2881 = vmatprep.subr.bf16.mxu0 %v3967_v17  ;;  %2967 = vmatprep.subr.bf16.mxu1 %v3970_v18  ;;  %v4150_v16 = vld [vmem:[%s5469_s2 + $0xc] ss:$16 sps:$4 sm:$0xff]   ;;  %v4058_v17 = vld [vmem:[%s5468_s5 + $0x220] ss:$16 sps:$4 sm:$0xff]   ;;  %v4061_v18 = vld [vmem:[%s5468_s5 + $0x228] ss:$16 sps:$4 sm:$0xff]  }
 0x10b   :  { %2882 = vmatpush1.bf16.msra.mxu0 %v3965_v19  ;;  %2968 = vmatpush1.bf16.msra.mxu1 %v3968_v20  ;;  %v4066_v19 = vld [vmem:[%s5468_s5 + $0x244] ss:$16 sps:$4 sm:$0xff]   ;;  %v4069_v20 = vld [vmem:[%s5468_s5 + $0x24c] ss:$16 sps:$4 sm:$0xff]  }
 0x10c   :  { %2883 = vmatprep.subr.bf16.mxu0 %v3973_v21  ;;  %2969 = vmatprep.subr.bf16.mxu1 %v3976_v22  ;;  %v169_v21 = vlaneseq  ;;  %v4064_v22 = vld [vmem:[%s5468_s5 + $0x240] ss:$16 sps:$4 sm:$0xff]  }
 0x10f   :  { %2884 = vmatpush1.bf16.msra.mxu0 %v3971_v23  ;;  %2970 = vmatpush1.bf16.msra.mxu1 %v3974_v24  ;;  %v4067_v23 = vld [vmem:[%s5468_s5 + $0x248] ss:$16 sps:$4 sm:$0xff]   ;;  %v4072_v24 = vld [vmem:[%s5468_s5 + $0x264] ss:$16 sps:$4 sm:$0xff]  }
 0x110   :  { %2885 = vmatprep.subr.bf16.mxu0 %v3979_v25  ;;  %2971 = vmatprep.subr.bf16.mxu1 %v3982_v26  ;;  %v4075_v25 = vld [vmem:[%s5468_s5 + $0x26c] ss:$16 sps:$4 sm:$0xff]   ;;  %v170_v26 = vshrl.u32 %v169_v21, 7  ;;  %v4115_v21 = vld [vmem:[%s5468_s5 + $0x348] ss:$16 sps:$4 sm:$0xff]  }
 0x113   :  { %2886 = vmatpush1.bf16.msra.mxu0 %v3977_v27  ;;  %2972 = vmatpush1.bf16.msra.mxu1 %v3980_v28  ;;  %v4070_v27 = vld [vmem:[%s5468_s5 + $0x260] ss:$16 sps:$4 sm:$0xff]   ;;  %v4073_v28 = vld [vmem:[%s5468_s5 + $0x268] ss:$16 sps:$4 sm:$0xff]  }
 0x114   :  { %2887 = vmatprep.subr.bf16.mxu0 %v3985_v29  ;;  %2973 = vmatprep.subr.bf16.mxu1 %v3988_v30  ;;  %v4078_v29 = vld [vmem:[%s5468_s5 + $0x284] ss:$16 sps:$4 sm:$0xff]   ;;  %v4081_v30 = vld [vmem:[%s5468_s5 + $0x28c] ss:$16 sps:$4 sm:$0xff]  }
 0x117   :  { %2888 = vmatpush1.bf16.msra.mxu0 %v3983_v31  ;;  %2974 = vmatpush1.bf16.msra.mxu1 %v3986_v32  ;;  %v5258_v31 = vsub.s32 0, %v170_v26  ;;  %v5260_v32 = vsub.s32 2, %v170_v26 }
 0x118   :  { %2889 = vmatprep.subr.bf16.mxu0 %v3991_v33  ;;  %2975 = vmatprep.subr.bf16.mxu1 %v3994_v34  ;;  %v5262_v33 = vsub.s32 1, %v170_v26  ;;  %v5264_v34 = vsub.s32 3, %v170_v26  ;;  %v4126_v26 = vld [vmem:[%s5468_s5 + $0x384] ss:$16 sps:$4 sm:$0xff]  }
 0x11b   :  { %2890 = vmatpush1.bf16.msra.mxu0 %v3989_v35  ;;  %2976 = vmatpush1.bf16.msra.mxu1 %v3992_v36  ;;  %v4076_v35 = vld [vmem:[%s5468_s5 + $0x280] ss:$16 sps:$4 sm:$0xff]   ;;  %v4079_v36 = vld [vmem:[%s5468_s5 + $0x288] ss:$16 sps:$4 sm:$0xff]  }
 0x11c   :  { %2891 = vmatprep.subr.bf16.mxu0 %v3997_v37  ;;  %2977 = vmatprep.subr.bf16.mxu1 %v4000_v38  ;;  %v167_v37 = vld [vmem:[%s5470_s6] sm:$0xf]  ;;  %v4084_v38 = vld [vmem:[%s5468_s5 + $0x2a4] ss:$16 sps:$4 sm:$0xff]  }
 0x11f   :  { %2892 = vmatpush1.bf16.msra.mxu0 %v3995_v39  ;;  %2978 = vmatpush1.bf16.msra.mxu1 %v3998_v40  ;;  %v4087_v39 = vld [vmem:[%s5468_s5 + $0x2ac] ss:$16 sps:$4 sm:$0xff]   ;;  %v172_v40 = vrot.slane %v167_v37, %v5258_v31 }
 0x120   :  { %2893 = vmatprep.subr.bf16.mxu0 %v4003_v41  ;;  %2979 = vmatprep.subr.bf16.mxu1 %v4006_v42  ;;  %v180_v41 = vrot.slane %v167_v37, %v5260_v32  ;;  %v176_v42 = vrot.slane %v167_v37, %v5262_v33 }
 0x123   :  { %2894 = vmatpush1.bf16.msra.mxu0 %v4001_v43  ;;  %2980 = vmatpush1.bf16.msra.mxu1 %v4004_v44  ;;  %v184_v43 = vrot.slane %v167_v37, %v5264_v34  ;;  %v4082_v44 = vld [vmem:[%s5468_s5 + $0x2a0] ss:$16 sps:$4 sm:$0xff]   ;;  %v4133_v37 = vld [vmem:[%s5468_s5 + $0x3a8] ss:$16 sps:$4 sm:$0xff]  }
 0x124   :  { %2895 = vmatprep.subr.bf16.mxu0 %v4009_v45  ;;  %2981 = vmatprep.subr.bf16.mxu1 %v4012_v46  ;;  %v4085_v45 = vld [vmem:[%s5468_s5 + $0x2a8] ss:$16 sps:$4 sm:$0xff]   ;;  %v4090_v46 = vld [vmem:[%s5468_s5 + $0x2c4] ss:$16 sps:$4 sm:$0xff]  }
 0x127   :  { %2896 = vmatpush1.bf16.msra.mxu0 %v4007_v47  ;;  %2982 = vmatpush1.bf16.msra.mxu1 %v4010_v48  ;;  %v4093_v47 = vld [vmem:[%s5468_s5 + $0x2cc] ss:$16 sps:$4 sm:$0xff]  }
 0x128   :  { %2897 = vmatprep.subr.bf16.mxu0 %v4015_v49  ;;  %2983 = vmatprep.subr.bf16.mxu1 %v4018_v50 }
 0x12b   :  { %2898 = vmatpush1.bf16.msra.mxu0 %v4013_v51  ;;  %2984 = vmatpush1.bf16.msra.mxu1 %v4016_v52 }
 0x12c   :  { %2899 = vmatprep.subr.bf16.mxu0 %v4021_v53  ;;  %2985 = vmatprep.subr.bf16.mxu1 %v4024_v54 }
 0x12f   :  { %2900 = vmatpush1.bf16.msra.mxu0 %v4019_v55  ;;  %2986 = vmatpush1.bf16.msra.mxu1 %v4022_v56 }
 0x130   :  { %2901 = vmatprep.subr.bf16.mxu0 %v4027_v57  ;;  %2987 = vmatprep.subr.bf16.mxu1 %v4030_v58  ;;  %v4088_v58 = vld [vmem:[%s5468_s5 + $0x2c0] ss:$16 sps:$4 sm:$0xff]  }
 0x133   :  { %2902 = vmatpush1.bf16.msra.mxu0 %v4025_v59  ;;  %2988 = vmatpush1.bf16.msra.mxu1 %v4028_v60  ;;  %v4091_v59 = vld [vmem:[%s5468_s5 + $0x2c8] ss:$16 sps:$4 sm:$0xff]  }
 0x134   :  { %2903 = vmatprep.subr.bf16.mxu0 %v4033_v61  ;;  %2989 = vmatprep.subr.bf16.mxu1 %v4036_v62 }
 0x137   :  { %2904 = vmatpush1.bf16.msra.mxu0 %v4031_v63  ;;  %2990 = vmatpush1.bf16.msra.mxu1 %v4034_v0  ;;  %v4096_v0 = vld [vmem:[%s5468_s5 + $0x2e4] ss:$16 sps:$4 sm:$0xff]  }
 0x138   :  { %2905 = vmatprep.subr.bf16.mxu0 %v4039_v1  ;;  %2991 = vmatprep.subr.bf16.mxu1 %v4042_v2  ;;  %v4099_v1 = vld [vmem:[%s5468_s5 + $0x2ec] ss:$16 sps:$4 sm:$0xff]  }
 0x13b   :  { %2906 = vmatpush1.bf16.msra.mxu0 %v4037_v3  ;;  %2992 = vmatpush1.bf16.msra.mxu1 %v4040_v4 }
 0x13c   :  { %2907 = vmatprep.subr.bf16.mxu0 %v4045_v5  ;;  %2993 = vmatprep.subr.bf16.mxu1 %v4048_v6 }
 0x13f   :  { %2908 = vmatpush1.bf16.msra.mxu0 %v4043_v7  ;;  %2994 = vmatpush1.bf16.msra.mxu1 %v4046_v8  ;;  %v4094_v8 = vld [vmem:[%s5468_s5 + $0x2e0] ss:$16 sps:$4 sm:$0xff]  }
 0x140   :  { %2920 = vmatprep.subr.bf16.mxu0 %v4054_v9  ;;  %3006 = vmatprep.subr.bf16.mxu1 %v4057_v10  ;;  %v4097_v9 = vld [vmem:[%s5468_s5 + $0x2e8] ss:$16 sps:$4 sm:$0xff]   ;;  %v4102_v10 = vld [vmem:[%s5468_s5 + $0x304] ss:$16 sps:$4 sm:$0xff]  }
 0x142   :  { %2910 = vmatmul.mubr.bf16.vlgmr.msra.gmra.mrb[8].mxu0 %v4049_v11  ;;  %2996 = vmatmul.mubr.bf16.vlgmr.msra.gmra.mrb[8].mxu1 %v4049_v11  ;;  %v4105_v11 = vld [vmem:[%s5468_s5 + $0x30c] ss:$16 sps:$4 sm:$0xff]  }
 0x143   :  { %2921 = vmatpush1.bf16.msra.mxu0 %v4052_v12  ;;  %3007 = vmatpush1.bf16.msra.mxu1 %v4055_v13  ;;  %v4100_v12 = vld [vmem:[%s5468_s5 + $0x300] ss:$16 sps:$4 sm:$0xff]   ;;  %v4103_v13 = vld [vmem:[%s5468_s5 + $0x308] ss:$16 sps:$4 sm:$0xff]  }
 0x144   :  { %2922 = vmatprep.subr.bf16.mxu0 %v4060_v14  ;;  %3008 = vmatprep.subr.bf16.mxu1 %v4063_v15  ;;  %v4108_v14 = vld [vmem:[%s5468_s5 + $0x324] ss:$16 sps:$4 sm:$0xff]   ;;  %v4111_v15 = vld [vmem:[%s5468_s5 + $0x32c] ss:$16 sps:$4 sm:$0xff]  }
 0x145   :  { %2952 = vmatprep.mubr.bf16.mxu0 %v4150_v16  ;;  %3038 = vmatprep.mubr.bf16.mxu1 %v4150_v16  ;;  %v4106_v16 = vld [vmem:[%s5468_s5 + $0x320] ss:$16 sps:$4 sm:$0xff]  }
 0x147   :  { %2923 = vmatpush1.bf16.msra.mxu0 %v4058_v17  ;;  %3009 = vmatpush1.bf16.msra.mxu1 %v4061_v18  ;;  %v4109_v17 = vld [vmem:[%s5468_s5 + $0x328] ss:$16 sps:$4 sm:$0xff]   ;;  %v4114_v18 = vld [vmem:[%s5468_s5 + $0x344] ss:$16 sps:$4 sm:$0xff]  }
 0x148   :  { %2924 = vmatprep.subr.bf16.mxu0 %v4066_v19  ;;  %3010 = vmatprep.subr.bf16.mxu1 %v4069_v20  ;;  %v4117_v19 = vld [vmem:[%s5468_s5 + $0x34c] ss:$16 sps:$4 sm:$0xff]   ;;  %v4112_v20 = vld [vmem:[%s5468_s5 + $0x340] ss:$16 sps:$4 sm:$0xff]  }
 0x14b   :  { %2925 = vmatpush1.bf16.msra.mxu0 %v4064_v22  ;;  %3011 = vmatpush1.bf16.msra.mxu1 %v4067_v23  ;;  %v4120_v22 = vld [vmem:[%s5468_s5 + $0x364] ss:$16 sps:$4 sm:$0xff]   ;;  %v4123_v23 = vld [vmem:[%s5468_s5 + $0x36c] ss:$16 sps:$4 sm:$0xff]  }
 0x14c   :  { %2926 = vmatprep.subr.bf16.mxu0 %v4072_v24  ;;  %3012 = vmatprep.subr.bf16.mxu1 %v4075_v25  ;;  %v4118_v24 = vld [vmem:[%s5468_s5 + $0x360] ss:$16 sps:$4 sm:$0xff]   ;;  %v4121_v25 = vld [vmem:[%s5468_s5 + $0x368] ss:$16 sps:$4 sm:$0xff]  }
 0x14f   :  { %2927 = vmatpush1.bf16.msra.mxu0 %v4070_v27  ;;  %3013 = vmatpush1.bf16.msra.mxu1 %v4073_v28  ;;  %v4129_v27 = vld [vmem:[%s5468_s5 + $0x38c] ss:$16 sps:$4 sm:$0xff]   ;;  %v4124_v28 = vld [vmem:[%s5468_s5 + $0x380] ss:$16 sps:$4 sm:$0xff]  }
 0x150   :  { %2928 = vmatprep.subr.bf16.mxu0 %v4078_v29  ;;  %3014 = vmatprep.subr.bf16.mxu1 %v4081_v30  ;;  %v4127_v29 = vld [vmem:[%s5468_s5 + $0x388] ss:$16 sps:$4 sm:$0xff]   ;;  %v4132_v30 = vld [vmem:[%s5468_s5 + $0x3a4] ss:$16 sps:$4 sm:$0xff]  }
 0x153   :  { %2929 = vmatpush1.bf16.msra.mxu0 %v4076_v35  ;;  %3015 = vmatpush1.bf16.msra.mxu1 %v4079_v36  ;;  %v4135_v35 = vld [vmem:[%s5468_s5 + $0x3ac] ss:$16 sps:$4 sm:$0xff]   ;;  %v4130_v36 = vld [vmem:[%s5468_s5 + $0x3a0] ss:$16 sps:$4 sm:$0xff]  }
 0x154   :  { %2930 = vmatprep.subr.bf16.mxu0 %v4084_v38  ;;  %3016 = vmatprep.subr.bf16.mxu1 %v4087_v39  ;;  %v4138_v38 = vld [vmem:[%s5468_s5 + $0x3c4] ss:$16 sps:$4 sm:$0xff]   ;;  %v4141_v39 = vld [vmem:[%s5468_s5 + $0x3cc] ss:$16 sps:$4 sm:$0xff]  }
 0x155   :  { %v926_v48 = vpop.f32.mrb[0].mxu0  ;;  %v1012_v49 = vpop.f32.mrb[0].mxu1 }
 0x156   :  { %v3509_v50 = vadd.f32 %v926_v48, %v172_v40  ;;  %v3513_v51 = vadd.f32 %v1012_v49, %v180_v41  ;;  %v928_v52 = vpop.f32.mrb[1].mxu0  ;;  %v1014_v53 = vpop.f32.mrb[1].mxu1 }
 0x157   :  { %v3510_v54 = vadd.f32 %v928_v52, %v176_v42  ;;  %v3514_v55 = vadd.f32 %v1014_v53, %v184_v43  ;;  %v930_v56 = vpop.f32.mrb[2].mxu0  ;;  %v1016_v57 = vpop.f32.mrb[2].mxu1  ;;  %2931 = vmatpush1.bf16.msra.mxu0 %v4082_v44  ;;  %3017 = vmatpush1.bf16.msra.mxu1 %v4085_v45  ;;  %v4142_v44 = vld [vmem:[%s5468_s5 + $0x3e0] ss:$16 sps:$4 sm:$0xff]   ;;  %v4145_v45 = vld [vmem:[%s5468_s5 + $0x3e8] ss:$16 sps:$4 sm:$0xff]  }
 0x158   :  { %v3511_v60 = vadd.f32 %v930_v56, %v172_v40  ;;  %v3515_v61 = vadd.f32 %v1016_v57, %v180_v41  ;;  %v932_v62 = vpop.f32.mrb[3].mxu0  ;;  %v1018_v63 = vpop.f32.mrb[3].mxu1  ;;  %2932 = vmatprep.subr.bf16.mxu0 %v4090_v46  ;;  %3018 = vmatprep.subr.bf16.mxu1 %v4093_v47  ;;  %v4136_v40 = vld [vmem:[%s5468_s5 + $0x3c0] ss:$16 sps:$4 sm:$0xff]   ;;  %v4139_v41 = vld [vmem:[%s5468_s5 + $0x3c8] ss:$16 sps:$4 sm:$0xff]  }
 0x159   :  { %v3497_v2 = vpack.c.bf16 %v3510_v54, %v3509_v50  ;;  %v3498_v3 = vpack.c.bf16 %v3514_v55, %v3513_v51  ;;  %v3512_v4 = vadd.f32 %v932_v62, %v176_v42  ;;  %v3516_v5 = vadd.f32 %v1018_v63, %v184_v43  ;;  %v4144_v42 = vld [vmem:[%s5468_s5 + $0x3e4] ss:$16 sps:$4 sm:$0xff]   ;;  %v4147_v43 = vld [vmem:[%s5468_s5 + $0x3ec] ss:$16 sps:$4 sm:$0xff]   ;;  %v4148_v46 = vld [vmem:[%s5469_s2 + $0x8] ss:$16 sps:$4 sm:$0xff]  }
 0x15a   :  { %v1181_v47 = vld [vmem:[%s5472_s7] sm:$0xf] }
 0x15b   :  { %1045 = vst [vmem:[%s5471_s9] sm:$0xff] %v3497_v2  ;;  %1046 = vst [vmem:[%s5471_s9 + $0x8] sm:$0xff] %v3498_v3  ;;  %v3499_v6 = vpack.c.bf16 %v3512_v4, %v3511_v60  ;;  %v3500_v7 = vpack.c.bf16 %v3516_v5, %v3515_v61  ;;  %2933 = vmatpush1.bf16.msra.mxu0 %v4088_v58  ;;  %3019 = vmatpush1.bf16.msra.mxu1 %v4091_v59 }
 0x15c   :  { %2934 = vmatprep.subr.bf16.mxu0 %v4096_v0  ;;  %3020 = vmatprep.subr.bf16.mxu1 %v4099_v1  ;;  %v1186_v48 = vrot.slane %v1181_v47, %v5258_v31  ;;  %v1194_v49 = vrot.slane %v1181_v47, %v5260_v32  ;;  %v1190_v50 = vrot.slane %v1181_v47, %v5262_v33 }
 0x15d   :  { %1047 = vst [vmem:[%s5471_s9 + $0x10] sm:$0xff] %v3499_v6  ;;  %1048 = vst [vmem:[%s5471_s9 + $0x18] sm:$0xff] %v3500_v7  ;;  %v1198_v51 = vrot.slane %v1181_v47, %v5264_v34 }
 0x15f   :  { %2935 = vmatpush1.bf16.msra.mxu0 %v4094_v8  ;;  %3021 = vmatpush1.bf16.msra.mxu1 %v4097_v9  ;;  %v2195_v8 = vld [vmem:[%s5474_s8] sm:$0xf] }
 0x160   :  { %2936 = vmatprep.subr.bf16.mxu0 %v4102_v10  ;;  %3022 = vmatprep.subr.bf16.mxu1 %v4105_v11  ;;  %v2200_v9 = vrot.slane %v2195_v8, %v5258_v31  ;;  %v2208_v10 = vrot.slane %v2195_v8, %v5260_v32  ;;  %v2204_v11 = vrot.slane %v2195_v8, %v5262_v33 }
 0x163   :  { %2937 = vmatpush1.bf16.msra.mxu0 %v4100_v12  ;;  %3023 = vmatpush1.bf16.msra.mxu1 %v4103_v13  ;;  %v2212_v12 = vrot.slane %v2195_v8, %v5264_v34 }
 0x164   :  { %2938 = vmatprep.subr.bf16.mxu0 %v4108_v14  ;;  %3024 = vmatprep.subr.bf16.mxu1 %v4111_v15 }
 0x167   :  { %2939 = vmatpush1.bf16.msra.mxu0 %v4106_v16  ;;  %3025 = vmatpush1.bf16.msra.mxu1 %v4109_v17 }
 0x168   :  { %2940 = vmatprep.subr.bf16.mxu0 %v4114_v18  ;;  %3026 = vmatprep.subr.bf16.mxu1 %v4117_v19 }
 0x16b   :  { %2941 = vmatpush1.bf16.msra.mxu0 %v4112_v20  ;;  %3027 = vmatpush1.bf16.msra.mxu1 %v4115_v21 }
 0x16c   :  { %2942 = vmatprep.subr.bf16.mxu0 %v4120_v22  ;;  %3028 = vmatprep.subr.bf16.mxu1 %v4123_v23 }
 0x16f   :  { %2943 = vmatpush1.bf16.msra.mxu0 %v4118_v24  ;;  %3029 = vmatpush1.bf16.msra.mxu1 %v4121_v25 }
 0x170   :  { %2944 = vmatprep.subr.bf16.mxu0 %v4126_v26  ;;  %3030 = vmatprep.subr.bf16.mxu1 %v4129_v27 }
 0x173   :  { %2945 = vmatpush1.bf16.msra.mxu0 %v4124_v28  ;;  %3031 = vmatpush1.bf16.msra.mxu1 %v4127_v29 }
 0x174   :  { %2946 = vmatprep.subr.bf16.mxu0 %v4132_v30  ;;  %3032 = vmatprep.subr.bf16.mxu1 %v4135_v35 }
 0x177   :  { %2947 = vmatpush1.bf16.msra.mxu0 %v4130_v36  ;;  %3033 = vmatpush1.bf16.msra.mxu1 %v4133_v37 }
 0x178   :  { %2948 = vmatprep.subr.bf16.mxu0 %v4138_v38  ;;  %3034 = vmatprep.subr.bf16.mxu1 %v4141_v39 }
 0x17b   :  { %2949 = vmatpush1.bf16.msra.mxu0 %v4136_v40  ;;  %3035 = vmatpush1.bf16.msra.mxu1 %v4139_v41 }
 0x17c   :  { %2950 = vmatprep.subr.bf16.mxu0 %v4144_v42  ;;  %3036 = vmatprep.subr.bf16.mxu1 %v4147_v43 }
 0x17f   :  { %2951 = vmatpush1.bf16.msra.mxu0 %v4142_v44  ;;  %3037 = vmatpush1.bf16.msra.mxu1 %v4145_v45 }
 0x182   :  { %2953 = vmatmul.mubr.bf16.vlgmr.msra.gmra.mrb[8].mxu0 %v4148_v46  ;;  %3039 = vmatmul.mubr.bf16.vlgmr.msra.gmra.mrb[8].mxu1 %v4148_v46 }
 0x1d5   :  { %v1940_v52 = vpop.f32.mrb[4].mxu0  ;;  %v2026_v53 = vpop.f32.mrb[4].mxu1 }
 0x1d6   :  { %v3517_v54 = vadd.f32 %v1940_v52, %v1186_v48  ;;  %v3521_v55 = vadd.f32 %v2026_v53, %v1194_v49  ;;  %v1942_v56 = vpop.f32.mrb[5].mxu0  ;;  %v2028_v57 = vpop.f32.mrb[5].mxu1 }
 0x1d7   :  { %v3518_v58 = vadd.f32 %v1942_v56, %v1190_v50  ;;  %v3522_v59 = vadd.f32 %v2028_v57, %v1198_v51  ;;  %v1944_v60 = vpop.f32.mrb[6].mxu0  ;;  %v2030_v61 = vpop.f32.mrb[6].mxu1 }
 0x1d8   :  { %v3519_v62 = vadd.f32 %v1944_v60, %v1186_v48  ;;  %v3523_v63 = vadd.f32 %v2030_v61, %v1194_v49  ;;  %v1946_v0 = vpop.f32.mrb[7].mxu0  ;;  %v2032_v1 = vpop.f32.mrb[7].mxu1 }
 0x1d9   :  { %v3501_v2 = vpack.c.bf16 %v3518_v58, %v3517_v54  ;;  %v3502_v3 = vpack.c.bf16 %v3522_v59, %v3521_v55  ;;  %v3520_v4 = vadd.f32 %v1946_v0, %v1190_v50  ;;  %v3524_v5 = vadd.f32 %v2032_v1, %v1198_v51 }
 0x1db   :  { %2059 = vst [vmem:[%s5473_s10] sm:$0xff] %v3501_v2  ;;  %2060 = vst [vmem:[%s5473_s10 + $0x8] sm:$0xff] %v3502_v3  ;;  %v3503_v6 = vpack.c.bf16 %v3520_v4, %v3519_v62  ;;  %v3504_v7 = vpack.c.bf16 %v3524_v5, %v3523_v63 }
 0x1dd   :  { %2061 = vst [vmem:[%s5473_s10 + $0x10] sm:$0xff] %v3503_v6  ;;  %2062 = vst [vmem:[%s5473_s10 + $0x18] sm:$0xff] %v3504_v7 }
 0x255   :  { %v2954_v13 = vpop.f32.mrb[8].mxu0  ;;  %v3040_v14 = vpop.f32.mrb[8].mxu1 }
 0x256   :  { %v3525_v15 = vadd.f32 %v2954_v13, %v2200_v9  ;;  %v3529_v16 = vadd.f32 %v3040_v14, %v2208_v10  ;;  %v2956_v17 = vpop.f32.mrb[9].mxu0  ;;  %v3042_v18 = vpop.f32.mrb[9].mxu1 }
 0x257   :  { %v3526_v19 = vadd.f32 %v2956_v17, %v2204_v11  ;;  %v3530_v20 = vadd.f32 %v3042_v18, %v2212_v12  ;;  %v2958_v21 = vpop.f32.mrb[10].mxu0  ;;  %v3044_v22 = vpop.f32.mrb[10].mxu1 }
 0x258   :  { %v3527_v23 = vadd.f32 %v2958_v21, %v2200_v9  ;;  %v3531_v24 = vadd.f32 %v3044_v22, %v2208_v10  ;;  %v2960_v25 = vpop.f32.mrb[11].mxu0  ;;  %v3046_v31 = vpop.f32.mrb[11].mxu1 }
 0x259   :  { %v3505_v26 = vpack.c.bf16 %v3526_v19, %v3525_v15  ;;  %v3506_v32 = vpack.c.bf16 %v3530_v20, %v3529_v16  ;;  %v3528_v27 = vadd.f32 %v2960_v25, %v2204_v11  ;;  %v3532_v33 = vadd.f32 %v3046_v31, %v2212_v12 }
 0x25b   :  { %3073 = vst [vmem:[%s5475_s11] sm:$0xff] %v3505_v26  ;;  %3074 = vst [vmem:[%s5475_s11 + $0x8] sm:$0xff] %v3506_v32  ;;  %v3507_v34 = vpack.c.bf16 %v3528_v27, %v3527_v23  ;;  %v3508_v28 = vpack.c.bf16 %v3532_v33, %v3531_v24 }
 0x25d   :  { %3075 = vst [vmem:[%s5475_s11 + $0x10] sm:$0xff] %v3507_v34  ;;  %3076 = vst [vmem:[%s5475_s11 + $0x18] sm:$0xff] %v3508_v28 }

</bundles_post_ra>
